<compile_context>
chip_gen: v5e
topology: v5e:2x2
jax: 0.10.0
libtpu: 0.0.40
codegen_flags: <defaults>
</compile_context>

<pallas_src>
import numpy as np
import jax
import jax.numpy as jnp
from jax.experimental import pallas as pl
from jax.experimental.pallas import tpu as pltpu


# ---------------------------------------------------------------------------
# Static network dimensions
# ---------------------------------------------------------------------------
C_IN, H_IN, W_IN = 4, 16, 16
C_CONV, KH, KW, STRIDE, PAD = 8, 3, 3, 2, 1
OH = (H_IN + 2 * PAD - KH) // STRIDE + 1        # 8
OW = (W_IN + 2 * PAD - KW) // STRIDE + 1        # 8
FEAT_IN = OH * OW * C_CONV                      # 512
FEAT = 256                                      # shared_cnn output features
HID = 100                                       # fc1 real width
HID_PAD = 128                                   # fc1 lane-padded width
ACT = 5                                         # action dim


# ---------------------------------------------------------------------------
# Fused kernel: conv(Toeplitz) + ReLU -> 512->256 + ReLU -> fc1 + ReLU -> fc2
#               -> logits, log_softmax(logits)   (Categorical parameters)
# ---------------------------------------------------------------------------
def actor_fused_kernel(x_ref, wt_ref, bt_ref, wf_ref, bf_ref,
                       w1_ref, b1_ref, w2_ref, b2_ref,
                       logits_ref, logp_ref):
    # shared_cnn conv as a dense matmul: (B,1024) @ (1024,512), + bias, ReLU
    h = jnp.dot(x_ref[...], wt_ref[...], preferred_element_type=jnp.float32)
    h = jnp.maximum(h + bt_ref[...], 0.0)

    # shared_cnn tail: Linear 512 -> 256, ReLU
    h = jnp.dot(h, wf_ref[...], preferred_element_type=jnp.float32)
    h = jnp.maximum(h + bf_ref[...], 0.0)

    # fc1: 256 -> 128 (100 real + 28 zero-padded lanes), ReLU
    h = jnp.dot(h, w1_ref[...], preferred_element_type=jnp.float32)
    h = jnp.maximum(h + b1_ref[...], 0.0)

    # fc2: 128 -> 5 (zero-padded K rows line up with the zero-padded lanes)
    logits = jnp.dot(h, w2_ref[...], preferred_element_type=jnp.float32)
    logits = logits + b2_ref[...]
    logits_ref[...] = logits

    # Categorical(logits=...): log_probs = logits - logsumexp(logits)
    m = jnp.max(logits, axis=-1, keepdims=True)
    lse = m + jnp.log(jnp.sum(jnp.exp(logits - m), axis=-1, keepdims=True))
    logp_ref[...] = logits - lse


def actor_head_fused(x_flat, params):
    B = x_flat.shape[0]
    vmem = pl.BlockSpec(memory_space=pltpu.MemorySpace.VMEM)
    return pl.pallas_call(
        actor_fused_kernel,
        out_shape=(
            jax.ShapeDtypeStruct((B, ACT), jnp.float32),   # logits
            jax.ShapeDtypeStruct((B, ACT), jnp.float32),   # normalized log-probs
        ),
        in_specs=[vmem] * 9,
        out_specs=(vmem, vmem),
    )(x_flat,
      params["w_toep"], params["b_toep"],
      params["w_feat"], params["b_feat"],
      params["w_fc1"], params["b_fc1"],
      params["w_fc2"], params["b_fc2"])


# ---------------------------------------------------------------------------
# Parameter construction (one-time, host side)
# ---------------------------------------------------------------------------
def orthogonal_init(key, shape, std):
    # Mirrors torch.nn.init.orthogonal_(weight, std) on a 2-D weight.
    return jax.nn.initializers.orthogonal(scale=std)(key, shape, jnp.float32)


def build_conv_toeplitz(w_conv, b_conv):
    """Fold conv3x3/s2/p1 (zero padding + im2col + NHWC (oh,ow,c) flatten) into
    a dense matrix T acting on the flat NCHW image:
        relu_conv_flat(x) == relu(x.reshape(B, C*H*W) @ T + b_full).
    NOTE: if loading real PyTorch weights, permute torch's (Cout,Cin,kh,kw)
    conv weight into the (kh,kw,cin)->cout layout used here first.
    """
    w4 = np.asarray(w_conv).reshape(KH, KW, C_IN, C_CONV)
    T = np.zeros((C_IN, H_IN, W_IN, OH, OW, C_CONV), np.float32)
    for ki in range(KH):
        for kj in range(KW):
            for oh in range(OH):
                for ow in range(OW):
                    h = STRIDE * oh + ki - PAD
                    w = STRIDE * ow + kj - PAD
                    if 0 <= h < H_IN and 0 <= w < W_IN:
                        T[:, h, w, oh, ow, :] += w4[ki, kj]
    T = T.reshape(C_IN * H_IN * W_IN, OH * OW * C_CONV)
    b_full = np.tile(np.asarray(b_conv).reshape(1, C_CONV), (1, OH * OW))
    return jnp.asarray(T), jnp.asarray(b_full)


def make_params(key):
    k = jax.random.split(key, 4)
    params = {}
    # shared_cnn conv: 4->8 channels, 3x3/s2/p1, weight rows ordered (kh,kw,cin)
    w_conv = orthogonal_init(k[0], (KH * KW * C_IN, C_CONV), 1.41)
    b_conv = jnp.zeros((C_CONV,), jnp.float32)
    params["w_conv"], params["b_conv"] = w_conv, b_conv          # kept for ref check
    params["w_toep"], params["b_toep"] = build_conv_toeplitz(w_conv, b_conv)
    # shared_cnn tail: 512 -> 256
    params["w_feat"] = orthogonal_init(k[1], (FEAT_IN, FEAT), 1.41)
    params["b_feat"] = jnp.zeros((1, FEAT), jnp.float32)
    # fc1: 256 -> 100 (std 1.41), zero-padded to 128 lanes (exact through ReLU)
    w_fc1 = orthogonal_init(k[2], (FEAT, HID), 1.41)
    params["w_fc1"] = jnp.pad(w_fc1, ((0, 0), (0, HID_PAD - HID)))
    params["b_fc1"] = jnp.zeros((1, HID_PAD), jnp.float32)
    # fc2: 100 -> 5 (std 0.01), zero-padded K rows 100 -> 128
    w_fc2 = orthogonal_init(k[3], (HID, ACT), 0.01)
    params["w_fc2"] = jnp.pad(w_fc2, ((0, HID_PAD - HID), (0, 0)))
    params["b_fc2"] = jnp.zeros((1, ACT), jnp.float32)
    return params


# ---------------------------------------------------------------------------
# Forward
# ---------------------------------------------------------------------------
@jax.jit
def actor_forward(x_nchw, params):
    """Returns (logits, log_probs) — the parameters of Categorical(logits=...)."""
    B = x_nchw.shape[0]
    # Only per-call XLA work: flatten NCHW; the Toeplitz conv weight absorbs the
    # layout transpose, zero padding and patch extraction.
    x_flat = x_nchw.astype(jnp.float32).reshape(B, C_IN * H_IN * W_IN)
    # TODO(synk): torch.distributions.Categorical itself (sampling/entropy API)
    # has no Pallas equivalent; its defining tensors are computed in-kernel.
    return actor_head_fused(x_flat, params)


def actor_forward_ref(x_nchw, params):
    """Pure-JAX reference (explicit im2col conv) for correctness checking."""
    B = x_nchw.shape[0]
    x = jnp.transpose(x_nchw, (0, 2, 3, 1)).astype(jnp.float32)        # NHWC
    xp = jnp.pad(x, ((0, 0), (PAD, PAD), (PAD, PAD), (0, 0)))
    cols = []
    for i in range(KH):
        for j in range(KW):
            cols.append(xp[:, i:i + STRIDE * OH:STRIDE, j:j + STRIDE * OW:STRIDE, :])
    patches = jnp.stack(cols, axis=3).reshape(B * OH * OW, KH * KW * C_IN)
    hp = jnp.maximum(patches @ params["w_conv"] + params["b_conv"][None, :], 0.0)
    feat = hp.reshape(B, FEAT_IN)
    feat = jnp.maximum(feat @ params["w_feat"] + params["b_feat"], 0.0)
    h = jnp.maximum(feat @ params["w_fc1"][:, :HID] + params["b_fc1"][:, :HID], 0.0)
    logits = h @ params["w_fc2"][:HID, :] + params["b_fc2"]
    return logits, jax.nn.log_softmax(logits, axis=-1)


if __name__ == "__main__":
    key = jax.random.PRNGKey(0)
    pkey, xkey = jax.random.split(key)
    params = make_params(pkey)

    # Small image batch consistent with the CNN front-end: (B=2, C=4, H=W=16)
    x = jax.random.normal(xkey, (2, C_IN, H_IN, W_IN), dtype=jnp.float32)

    logits, log_probs = actor_forward(x, params)
    jax.block_until_ready((logits, log_probs))

    assert logits.shape == (2, ACT) and log_probs.shape == (2, ACT)
    # log-probs must normalize to 1
    assert jnp.allclose(jnp.sum(jnp.exp(log_probs), axis=-1), 1.0, atol=1e-5)
    # cross-check against the pure-JAX reference (lenient tol for MXU precision)
    ref_logits, ref_logp = actor_forward_ref(x, params)
    assert jnp.allclose(logits, ref_logits, atol=5e-2, rtol=5e-2)
    assert jnp.allclose(log_probs, ref_logp, atol=5e-2, rtol=5e-2)
    print("KERNEL_OK")
</pallas_src>

<mosaic_0001>
module attributes {stable_mosaic.version = 11 : i64} {
  func.func @actor_fused_kernel(%arg0: memref<2x1024xf32, #tpu.memory_space<vmem>>, %arg1: memref<1024x512xf32, #tpu.memory_space<vmem>>, %arg2: memref<1x512xf32, #tpu.memory_space<vmem>>, %arg3: memref<512x256xf32, #tpu.memory_space<vmem>>, %arg4: memref<1x256xf32, #tpu.memory_space<vmem>>, %arg5: memref<256x128xf32, #tpu.memory_space<vmem>>, %arg6: memref<1x128xf32, #tpu.memory_space<vmem>>, %arg7: memref<128x5xf32, #tpu.memory_space<vmem>>, %arg8: memref<1x5xf32, #tpu.memory_space<vmem>>, %arg9: memref<2x5xf32, #tpu.memory_space<vmem>>, %arg10: memref<2x5xf32, #tpu.memory_space<vmem>>) attributes {dimension_semantics = [], scalar_prefetch = 0 : i64, scratch_operands = 0 : i64, tpu.core_type = #tpu.core_type<tc>} {
    %c0 = arith.constant 0 : index
    %c0_0 = arith.constant 0 : index
    %0 = vector.load %arg0[%c0, %c0_0] : memref<2x1024xf32, #tpu.memory_space<vmem>>, vector<2x1024xf32>
    %c0_1 = arith.constant 0 : index
    %c0_2 = arith.constant 0 : index
    %1 = vector.load %arg1[%c0_1, %c0_2] : memref<1024x512xf32, #tpu.memory_space<vmem>>, vector<1024x512xf32>
    %cst = arith.constant dense<0.000000e+00> : vector<2x512xf32>
    %2 = tpu.matmul %0, %1, %cst {dimension_numbers = #tpu.dot_dimension_numbers<[1], [0], [0], [1], [0, 0, 1, 1], [], []>} : vector<2x1024xf32>, vector<1024x512xf32>, vector<2x512xf32> -> vector<2x512xf32>
    %c0_3 = arith.constant 0 : index
    %c0_4 = arith.constant 0 : index
    %3 = vector.load %arg2[%c0_3, %c0_4] : memref<1x512xf32, #tpu.memory_space<vmem>>, vector<1x512xf32>
    %4 = vector.broadcast %3 : vector<1x512xf32> to vector<2x512xf32>
    %5 = arith.addf %2, %4 : vector<2x512xf32>
    %cst_5 = arith.constant 0.000000e+00 : f32
    %6 = vector.broadcast %cst_5 : f32 to vector<2x512xf32>
    %7 = arith.maximumf %5, %6 : vector<2x512xf32>
    %c0_6 = arith.constant 0 : index
    %c0_7 = arith.constant 0 : index
    %8 = vector.load %arg3[%c0_6, %c0_7] : memref<512x256xf32, #tpu.memory_space<vmem>>, vector<512x256xf32>
    %cst_8 = arith.constant dense<0.000000e+00> : vector<2x256xf32>
    %9 = tpu.matmul %7, %8, %cst_8 {dimension_numbers = #tpu.dot_dimension_numbers<[1], [0], [0], [1], [0, 0, 1, 1], [], []>} : vector<2x512xf32>, vector<512x256xf32>, vector<2x256xf32> -> vector<2x256xf32>
    %c0_9 = arith.constant 0 : index
    %c0_10 = arith.constant 0 : index
    %10 = vector.load %arg4[%c0_9, %c0_10] : memref<1x256xf32, #tpu.memory_space<vmem>>, vector<1x256xf32>
    %11 = vector.broadcast %10 : vector<1x256xf32> to vector<2x256xf32>
    %12 = arith.addf %9, %11 : vector<2x256xf32>
    %cst_11 = arith.constant 0.000000e+00 : f32
    %13 = vector.broadcast %cst_11 : f32 to vector<2x256xf32>
    %14 = arith.maximumf %12, %13 : vector<2x256xf32>
    %c0_12 = arith.constant 0 : index
    %c0_13 = arith.constant 0 : index
    %15 = vector.load %arg5[%c0_12, %c0_13] : memref<256x128xf32, #tpu.memory_space<vmem>>, vector<256x128xf32>
    %cst_14 = arith.constant dense<0.000000e+00> : vector<2x128xf32>
    %16 = tpu.matmul %14, %15, %cst_14 {dimension_numbers = #tpu.dot_dimension_numbers<[1], [0], [0], [1], [0, 0, 1, 1], [], []>} : vector<2x256xf32>, vector<256x128xf32>, vector<2x128xf32> -> vector<2x128xf32>
    %c0_15 = arith.constant 0 : index
    %c0_16 = arith.constant 0 : index
    %17 = vector.load %arg6[%c0_15, %c0_16] : memref<1x128xf32, #tpu.memory_space<vmem>>, vector<1x128xf32>
    %18 = vector.broadcast %17 : vector<1x128xf32> to vector<2x128xf32>
    %19 = arith.addf %16, %18 : vector<2x128xf32>
    %cst_17 = arith.constant 0.000000e+00 : f32
    %20 = vector.broadcast %cst_17 : f32 to vector<2x128xf32>
    %21 = arith.maximumf %19, %20 : vector<2x128xf32>
    %c0_18 = arith.constant 0 : index
    %c0_19 = arith.constant 0 : index
    %22 = vector.load %arg7[%c0_18, %c0_19] : memref<128x5xf32, #tpu.memory_space<vmem>>, vector<128x5xf32>
    %cst_20 = arith.constant dense<0.000000e+00> : vector<2x5xf32>
    %23 = tpu.matmul %21, %22, %cst_20 {dimension_numbers = #tpu.dot_dimension_numbers<[1], [0], [0], [1], [0, 0, 1, 1], [], []>} : vector<2x128xf32>, vector<128x5xf32>, vector<2x5xf32> -> vector<2x5xf32>
    %c0_21 = arith.constant 0 : index
    %c0_22 = arith.constant 0 : index
    %24 = vector.load %arg8[%c0_21, %c0_22] : memref<1x5xf32, #tpu.memory_space<vmem>>, vector<1x5xf32>
    %25 = vector.broadcast %24 : vector<1x5xf32> to vector<2x5xf32>
    %26 = arith.addf %23, %25 : vector<2x5xf32>
    %c0_23 = arith.constant 0 : index
    %c0_24 = arith.constant 0 : index
    %27 = vector.load %arg9[%c0_23, %c0_24] : memref<2x5xf32, #tpu.memory_space<vmem>>, vector<2x5xf32>
    tpu.vector_store %arg9[%c0_23, %c0_24], %26 {strides = array<i32>} : memref<2x5xf32, #tpu.memory_space<vmem>>, vector<2x5xf32>,
    %cst_25 = arith.constant dense<0xFF800000> : vector<2xf32>
    %28 = vector.multi_reduction <maximumf>, %26, %cst_25 [1] : vector<2x5xf32> to vector<2xf32>
    %29 = vector.shape_cast %28 : vector<2xf32> to vector<2x1xf32>
    %30 = vector.broadcast %29 : vector<2x1xf32> to vector<2x5xf32>
    %31 = arith.subf %26, %30 : vector<2x5xf32>
    %32 = math.exp %31 : vector<2x5xf32>
    %cst_26 = arith.constant dense<0.000000e+00> : vector<2xf32>
    %33 = vector.multi_reduction <add>, %32, %cst_26 [1] : vector<2x5xf32> to vector<2xf32>
    %34 = vector.shape_cast %33 : vector<2xf32> to vector<2x1xf32>
    %35 = math.log %34 : vector<2x1xf32>
    %36 = arith.addf %29, %35 : vector<2x1xf32>
    %37 = vector.broadcast %36 : vector<2x1xf32> to vector<2x5xf32>
    %38 = arith.subf %26, %37 : vector<2x5xf32>
    %c0_27 = arith.constant 0 : index
    %c0_28 = arith.constant 0 : index
    %39 = vector.load %arg10[%c0_27, %c0_28] : memref<2x5xf32, #tpu.memory_space<vmem>>, vector<2x5xf32>
    tpu.vector_store %arg10[%c0_27, %c0_28], %38 {strides = array<i32>} : memref<2x5xf32, #tpu.memory_space<vmem>>, vector<2x5xf32>,
    return
  }
}

</mosaic_0001>

<bundles_post_ra>
// kernel: actor_forward.1
= control target key start
LH: loop header
LB: loop body
LE: loop exit
PB: predicated region body
PF: predicated region fallthrough
CT: control target
= control target key end

     0   :  { %16 = vsyncpa [#allocation3], 0  ;;  %s2293_s0 = inlined_call_operand.vmem [shape: f32[2,1024], index: 0, kind: input, shape index: {}]   ;;  %s2294_s1 = inlined_call_operand.hbm [shape: f32[1024,512], index: 1, kind: input, shape index: {}]   ;;  %s2295_s2 = inlined_call_operand.hbm [shape: f32[1,512], index: 2, kind: input, shape index: {}]   ;;  %s2296_s3 = inlined_call_operand.hbm [shape: f32[512,256], index: 3, kind: input, shape index: {}]   ;;  %s2297_s4 = inlined_call_operand.hbm [shape: f32[1,256], index: 4, kind: input, shape index: {}]   ;;  %s2298_s5 = inlined_call_operand.hbm [shape: f32[256,128], index: 5, kind: input, shape index: {}]   ;;  %s2299_s6 = inlined_call_operand.hbm [shape: f32[1,128], index: 6, kind: input, shape index: {}]   ;;  %s2300_s7 = inlined_call_operand.vmem [shape: f32[128,5], index: 7, kind: input, shape index: {}]   ;;  %s2301_s8 = inlined_call_operand.hbm [shape: f32[1,5], index: 8, kind: input, shape index: {}]   ;;  %s2302_s9 = inlined_call_operand.hbm [shape: f32[2,5], index: 9, kind: output, shape index: {0}]   ;;  %s2303_s10 = inlined_call_operand.hbm [shape: f32[2,5], index: 10, kind: output, shape index: {1}]  }
   0x1   :  { %17 = vsyncpa [#allocation6], 0 }
   0x2   :  { %18 = vsyncpa [#allocation9], 0 }
   0x3   :  { %19 = vsyncpa [#allocation12], 0 }
   0x4   :  { %20 = vsyncpa [#allocation4], 0  ;;  %s42_s15 = sshll.u32 %s2295_s2, 4  ;;  %s43_s15 = int_to_ptr.hbm [resolvable:$true] %s42_s15 }
   0x5   :  { %21 = vsyncpa [#allocation16], 0  ;;  %s2048_s16 = smov [#allocation5]   ;;  %s66_s20 = sshll.u32 %s2297_s4, 4  ;;  %s67_s20 = int_to_ptr.hbm [resolvable:$true] %s66_s20 }
   0x6   :  { %s44_s17 = sshll.u32 %s2048_s16, 4  ;;  %s2049_s21 = smov [#allocation8]   ;;  %s45_s17 = int_to_ptr.vmem [resolvable:$true] %s44_s17 }
   0x7   :  { %47 = dma.hbm_to_vmem [thread:$0]  %s43_s15, 64, %s45_s17, [#allocation6]  }
   0x8   :  { %s68_s22 = sshll.u32 %s2049_s21, 4  ;;  %s90_s25 = sshll.u32 %s2299_s6, 4  ;;  %s69_s22 = int_to_ptr.vmem [resolvable:$true] %s68_s22  ;;  %s91_s25 = int_to_ptr.hbm [resolvable:$true] %s90_s25 }
   0x9   :  { %71 = dma.hbm_to_vmem [thread:$0]  %s67_s20, 32, %s69_s22, [#allocation9]  }
   0xa   :  { %s28_s27 = sshll.u32 %s2294_s1, 4  ;;  %s2050_s28 = smov [#allocation11]   ;;  %s29_s27 = int_to_ptr.hbm [resolvable:$true] %s28_s27 }
   0xb   :  { %s92_s29 = sshll.u32 %s2050_s28, 4  ;;  %s2051_s4 = smov [#allocation2]   ;;  %s93_s29 = int_to_ptr.vmem [resolvable:$true] %s92_s29 }
   0xc   :  { %95 = dma.hbm_to_vmem [thread:$0]  %s91_s25, 16, %s93_s29, [#allocation12]  }
   0xd   :  { %s30_s30 = sshll.u32 %s2051_s4, 4  ;;  %s2052_s11 = smov 512   ;;  %s31_s30 = int_to_ptr.vmem [resolvable:$true] %s30_s30 }
   0xe   :  { %s2053_s12 = smov 32   ;;  %s52_s14 = sshll.u32 %s2296_s3, 4  ;;  %s53_s14 = int_to_ptr.hbm [resolvable:$true] %s52_s14 }
   0xf   :  { %36 = dma.hbm_to_vmem [thread:$0]  %s29_s27, 65536, %s31_s30, [#allocation3], %s2052_s11, %s2052_s11, %s2053_s12  }
  0x10   :  { %s2054_s15 = smov [#allocation7]   ;;  %s76_s18 = sshll.u32 %s2298_s5, 4  ;;  %s77_s18 = int_to_ptr.hbm [resolvable:$true] %s76_s18 }
  0x11   :  { %s54_s16 = sshll.u32 %s2054_s15, 4  ;;  %s2055_s19 = smov 256   ;;  %s55_s16 = int_to_ptr.vmem [resolvable:$true] %s54_s16 }
  0x12   :  { %s2056_s20 = smov 16   ;;  %s2057_s21 = smov [#allocation10]  }
  0x13   :  { %60 = dma.hbm_to_vmem [thread:$0]  %s53_s14, 16384, %s55_s16, [#allocation6], %s2055_s19, %s2055_s19, %s2056_s20  }
  0x14   :  { %s78_s22 = sshll.u32 %s2057_s21, 4  ;;  %s2058_s23 = smov 128   ;;  %s79_s22 = int_to_ptr.vmem [resolvable:$true] %s78_s22 }
  0x15   :  { %s2059_s24 = smov 8   ;;  %s103_s2 = sshll.u32 %s2301_s8, 4  ;;  %s104_s2 = int_to_ptr.hbm [resolvable:$true] %s103_s2 }
  0x16   :  { %84 = dma.hbm_to_vmem [thread:$0]  %s77_s18, 4096, %s79_s22, [#allocation9], %s2058_s23, %s2058_s23, %s2059_s24  }
  0x17   :  { %s2060_s26 = smov [#allocation13]  }
  0x18   :  { %s105_s27 = sshll.u32 %s2060_s26, 4  ;;  %s106_s27 = int_to_ptr.vmem [resolvable:$true] %s105_s27 }
  0x19   :  { %108 = dma.hbm_to_vmem [thread:$0]  %s104_s2, 16, %s106_s27, [#allocation12]  }
  0x1a   :  { %2036 = dma.done.wait [#allocation3], 65536  }
  0x1b   :  { %2037 = vsyncadd [#allocation3], 4294901760 }
  0x1c   :  { %2038 = dma.done.wait [#allocation6], 16448  }
  0x1d   :  { %2039 = vsyncadd [#allocation6], 4294950848 }
  0x1e   :  { %2040 = dma.done.wait [#allocation9], 4128  }
  0x1f   :  { %2041 = vsyncadd [#allocation9], 4294963168 }
  0x20   :  { %2042 = dma.done.wait [#allocation12], 32  }
  0x21   :  { %2043 = vsyncadd [#allocation12], 4294967264  ;;  %v199_v0 = vld [vmem:[#allocation2 + $0x1e0] sm:$0xff]  ;;  %vm1739_vm0 = vcmask 33792   ;;  %s1762_s13 = sshll.u32 %s2302_s9, 4  ;;  %s2061_s6 = smov [#allocation14]   ;;  %s1763_s13 = int_to_ptr.hbm [resolvable:$true] %s1762_s13 }
  0x22   :  { %v263_v1 = vld [vmem:[#allocation2 + $0x3e0] sm:$0xff]  ;;  %682 = vmatpush.msra.mxu0 %v199_v0  ;;  %s1760_s14 = sshll.u32 %s2061_s6, 4  ;;  %s2062_s15 = smov [#allocation15]   ;;  %s1761_s14 = int_to_ptr.vmem [resolvable:$true] %s1760_s14 }
  0x23   :  { %v327_v2 = vld [vmem:[#allocation2 + $0x5e0] sm:$0xff]  ;;  %702 = vmatpush.msra.mxu1 %v263_v1  ;;  %s1771_s16 = sshll.u32 %s2062_s15, 4  ;;  %s1773_s18 = sshll.u32 %s2303_s10, 4  ;;  %s1772_s16 = int_to_ptr.vmem [resolvable:$true] %s1771_s16  ;;  %s1774_s18 = int_to_ptr.hbm [resolvable:$true] %s1773_s18 }
  0x24   :  { %v195_v3 = vld [vmem:[#allocation2 + $0x1c0] sm:$0xff]  ;;  %722 = vmatpush.msra.mxu2 %v327_v2 }
  0x25   :  { %v259_v4 = vld [vmem:[#allocation2 + $0x3c0] sm:$0xff]  ;;  %683 = vmatpush.msra.mxu0 %v195_v3 }
  0x26   :  { %v323_v5 = vld [vmem:[#allocation2 + $0x5c0] sm:$0xff]  ;;  %703 = vmatpush.msra.mxu1 %v259_v4 }
  0x27   :  { %v391_v6 = vld [vmem:[#allocation2 + $0x7e0] sm:$0xff]  ;;  %723 = vmatpush.msra.mxu2 %v323_v5 }
  0x28   :  { %v191_v7 = vld [vmem:[#allocation2 + $0x1a0] sm:$0xff]  ;;  %742 = vmatpush.msra.mxu3 %v391_v6 }
  0x29   :  { %v255_v8 = vld [vmem:[#allocation2 + $0x3a0] sm:$0xff]  ;;  %684 = vmatpush.msra.mxu0 %v191_v7 }
  0x2a   :  { %v319_v9 = vld [vmem:[#allocation2 + $0x5a0] sm:$0xff]  ;;  %704 = vmatpush.msra.mxu1 %v255_v8 }
  0x2b   :  { %v387_v10 = vld [vmem:[#allocation2 + $0x7c0] sm:$0xff]  ;;  %724 = vmatpush.msra.mxu2 %v319_v9 }
  0x2c   :  { %v187_v11 = vld [vmem:[#allocation2 + $0x180] sm:$0xff]  ;;  %743 = vmatpush.msra.mxu3 %v387_v10 }
  0x2d   :  { %v251_v12 = vld [vmem:[#allocation2 + $0x380] sm:$0xff]  ;;  %685 = vmatpush.msra.mxu0 %v187_v11 }
  0x2e   :  { %v315_v13 = vld [vmem:[#allocation2 + $0x580] sm:$0xff]  ;;  %705 = vmatpush.msra.mxu1 %v251_v12 }
  0x2f   :  { %v383_v14 = vld [vmem:[#allocation2 + $0x7a0] sm:$0xff]  ;;  %725 = vmatpush.msra.mxu2 %v315_v13 }
  0x30   :  { %v183_v15 = vld [vmem:[#allocation2 + $0x160] sm:$0xff]  ;;  %744 = vmatpush.msra.mxu3 %v383_v14 }
  0x31   :  { %v247_v16 = vld [vmem:[#allocation2 + $0x360] sm:$0xff]  ;;  %686 = vmatpush.msra.mxu0 %v183_v15 }
  0x32   :  { %v311_v17 = vld [vmem:[#allocation2 + $0x560] sm:$0xff]  ;;  %706 = vmatpush.msra.mxu1 %v247_v16 }
  0x33   :  { %v379_v18 = vld [vmem:[#allocation2 + $0x780] sm:$0xff]  ;;  %726 = vmatpush.msra.mxu2 %v311_v17 }
  0x34   :  { %v179_v19 = vld [vmem:[#allocation2 + $0x140] sm:$0xff]  ;;  %745 = vmatpush.msra.mxu3 %v379_v18 }
  0x35   :  { %v243_v20 = vld [vmem:[#allocation2 + $0x340] sm:$0xff]  ;;  %687 = vmatpush.msra.mxu0 %v179_v19 }
  0x36   :  { %v307_v21 = vld [vmem:[#allocation2 + $0x540] sm:$0xff]  ;;  %707 = vmatpush.msra.mxu1 %v243_v20 }
  0x37   :  { %v375_v22 = vld [vmem:[#allocation2 + $0x760] sm:$0xff]  ;;  %727 = vmatpush.msra.mxu2 %v307_v21 }
  0x38   :  { %v175_v23 = vld [vmem:[#allocation2 + $0x120] sm:$0xff]  ;;  %746 = vmatpush.msra.mxu3 %v375_v22 }
  0x39   :  { %v239_v24 = vld [vmem:[#allocation2 + $0x320] sm:$0xff]  ;;  %688 = vmatpush.msra.mxu0 %v175_v23 }
  0x3a   :  { %v303_v25 = vld [vmem:[#allocation2 + $0x520] sm:$0xff]  ;;  %708 = vmatpush.msra.mxu1 %v239_v24 }
  0x3b   :  { %v371_v26 = vld [vmem:[#allocation2 + $0x740] sm:$0xff]  ;;  %728 = vmatpush.msra.mxu2 %v303_v25  ;;  %v137_v25 = vld [vmem:[%s2293_s0] sm:$0xff] }
  0x3c   :  { %v171_v27 = vld [vmem:[#allocation2 + $0x100] sm:$0xff]  ;;  %747 = vmatpush.msra.mxu3 %v371_v26  ;;  %663 = vst [vmem:[#allocation1] ss:$4 sm:$0xff] %v137_v25  ;;  %v380_v25 = vld [vmem:[#allocation2 + $0x788] sm:$0xff] }
  0x3d   :  { %v235_v28 = vld [vmem:[#allocation2 + $0x300] sm:$0xff]  ;;  %689 = vmatpush.msra.mxu0 %v171_v27 }
  0x3e   :  { %v299_v29 = vld [vmem:[#allocation2 + $0x500] sm:$0xff]  ;;  %709 = vmatpush.msra.mxu1 %v235_v28 }
  0x3f   :  { %v367_v30 = vld [vmem:[#allocation2 + $0x720] sm:$0xff]  ;;  %729 = vmatpush.msra.mxu2 %v299_v29 }
  0x40   :  { %v167_v31 = vld [vmem:[#allocation2 + $0xe0] sm:$0xff]  ;;  %748 = vmatpush.msra.mxu3 %v367_v30 }
  0x41   :  { %v231_v32 = vld [vmem:[#allocation2 + $0x2e0] sm:$0xff]  ;;  %690 = vmatpush.msra.mxu0 %v167_v31 }
  0x42   :  { %v295_v33 = vld [vmem:[#allocation2 + $0x4e0] sm:$0xff]  ;;  %710 = vmatpush.msra.mxu1 %v231_v32 }
  0x43   :  { %v363_v34 = vld [vmem:[#allocation2 + $0x700] sm:$0xff]  ;;  %730 = vmatpush.msra.mxu2 %v295_v33 }
  0x44   :  { %v163_v35 = vld [vmem:[#allocation2 + $0xc0] sm:$0xff]  ;;  %749 = vmatpush.msra.mxu3 %v363_v34 }
  0x45   :  { %v227_v36 = vld [vmem:[#allocation2 + $0x2c0] sm:$0xff]  ;;  %691 = vmatpush.msra.mxu0 %v163_v35 }
  0x46   :  { %v291_v37 = vld [vmem:[#allocation2 + $0x4c0] sm:$0xff]  ;;  %711 = vmatpush.msra.mxu1 %v227_v36 }
  0x47   :  { %v359_v38 = vld [vmem:[#allocation2 + $0x6e0] sm:$0xff]  ;;  %731 = vmatpush.msra.mxu2 %v291_v37 }
  0x48   :  { %v159_v39 = vld [vmem:[#allocation2 + $0xa0] sm:$0xff]  ;;  %750 = vmatpush.msra.mxu3 %v359_v38 }
  0x49   :  { %v223_v40 = vld [vmem:[#allocation2 + $0x2a0] sm:$0xff]  ;;  %692 = vmatpush.msra.mxu0 %v159_v39 }
  0x4a   :  { %v287_v41 = vld [vmem:[#allocation2 + $0x4a0] sm:$0xff]  ;;  %712 = vmatpush.msra.mxu1 %v223_v40 }
  0x4b   :  { %v355_v42 = vld [vmem:[#allocation2 + $0x6c0] sm:$0xff]  ;;  %732 = vmatpush.msra.mxu2 %v287_v41 }
  0x4c   :  { %v155_v43 = vld [vmem:[#allocation2 + $0x80] sm:$0xff]  ;;  %751 = vmatpush.msra.mxu3 %v355_v42 }
  0x4d   :  { %v219_v44 = vld [vmem:[#allocation2 + $0x280] sm:$0xff]  ;;  %693 = vmatpush.msra.mxu0 %v155_v43 }
  0x4e   :  { %v283_v45 = vld [vmem:[#allocation2 + $0x480] sm:$0xff]  ;;  %713 = vmatpush.msra.mxu1 %v219_v44 }
  0x4f   :  { %v351_v46 = vld [vmem:[#allocation2 + $0x6a0] sm:$0xff]  ;;  %733 = vmatpush.msra.mxu2 %v283_v45 }
  0x50   :  { %v151_v47 = vld [vmem:[#allocation2 + $0x60] sm:$0xff]  ;;  %752 = vmatpush.msra.mxu3 %v351_v46 }
  0x51   :  { %v215_v48 = vld [vmem:[#allocation2 + $0x260] sm:$0xff]  ;;  %694 = vmatpush.msra.mxu0 %v151_v47 }
  0x52   :  { %v279_v49 = vld [vmem:[#allocation2 + $0x460] sm:$0xff]  ;;  %714 = vmatpush.msra.mxu1 %v215_v48 }
  0x53   :  { %v347_v50 = vld [vmem:[#allocation2 + $0x680] sm:$0xff]  ;;  %734 = vmatpush.msra.mxu2 %v279_v49 }
  0x54   :  { %v147_v51 = vld [vmem:[#allocation2 + $0x40] sm:$0xff]  ;;  %753 = vmatpush.msra.mxu3 %v347_v50 }
  0x55   :  { %v211_v52 = vld [vmem:[#allocation2 + $0x240] sm:$0xff]  ;;  %695 = vmatpush.msra.mxu0 %v147_v51 }
  0x56   :  { %v275_v53 = vld [vmem:[#allocation2 + $0x440] sm:$0xff]  ;;  %715 = vmatpush.msra.mxu1 %v211_v52 }
  0x57   :  { %v343_v54 = vld [vmem:[#allocation2 + $0x660] sm:$0xff]  ;;  %735 = vmatpush.msra.mxu2 %v275_v53 }
  0x58   :  { %v143_v55 = vld [vmem:[#allocation2 + $0x20] sm:$0xff]  ;;  %754 = vmatpush.msra.mxu3 %v343_v54 }
  0x59   :  { %v207_v56 = vld [vmem:[#allocation2 + $0x220] sm:$0xff]  ;;  %696 = vmatpush.msra.mxu0 %v143_v55 }
  0x5a   :  { %v271_v57 = vld [vmem:[#allocation2 + $0x420] sm:$0xff]  ;;  %716 = vmatpush.msra.mxu1 %v207_v56 }
  0x5b   :  { %v339_v58 = vld [vmem:[#allocation2 + $0x640] sm:$0xff]  ;;  %736 = vmatpush.msra.mxu2 %v271_v57 }
  0x5c   :  { %v139_v59 = vld [vmem:[#allocation2] sm:$0xff]  ;;  %755 = vmatpush.msra.mxu3 %v339_v58 }
  0x5d   :  { %v203_v60 = vld [vmem:[#allocation2 + $0x200] sm:$0xff]  ;;  %697 = vmatpush.msra.mxu0 %v139_v59 }
  0x5e   :  { %v267_v61 = vld [vmem:[#allocation2 + $0x400] sm:$0xff]  ;;  %717 = vmatpush.msra.mxu1 %v203_v60 }
  0x5f   :  { %v335_v62 = vld [vmem:[#allocation2 + $0x620] sm:$0xff]  ;;  %737 = vmatpush.msra.mxu2 %v267_v61 }
  0x60   :  { %v455_v63 = vld [vmem:[#allocation2 + $0x9e0] sm:$0xff]  ;;  %756 = vmatpush.msra.mxu3 %v335_v62 }
  0x61   :  { %v519_v0 = vld [vmem:[#allocation2 + $0xbe0] sm:$0xff]  ;;  %762 = vmatpush.msrb.mxu0 %v455_v63 }
  0x62   :  { %v583_v1 = vld [vmem:[#allocation2 + $0xde0] sm:$0xff]  ;;  %782 = vmatpush.msrb.mxu1 %v519_v0 }
  0x63   :  { %v331_v2 = vld [vmem:[#allocation2 + $0x600] sm:$0xff]  ;;  %802 = vmatpush.msrb.mxu2 %v583_v1  ;;  %v2145_v1 = vld.sshfl [vmem:[#allocation1] sm:$0xff pattern:$0x73625140] }
  0x64   :  { %v451_v3 = vld [vmem:[#allocation2 + $0x9c0] sm:$0xff]  ;;  %757 = vmatpush.msra.mxu3 %v331_v2  ;;  %698 = vmatmul.f32.vlgmr.msra.gmra.mxu0 %v2145_v1 }
  0x65   :  { %v515_v4 = vld [vmem:[#allocation2 + $0xbc0] sm:$0xff]  ;;  %763 = vmatpush.msrb.mxu0 %v451_v3  ;;  %v2149_v3 = vld.sshfl [vmem:[#allocation1 + $0x10] sm:$0xff pattern:$0x73625140] }
  0x66   :  { %v579_v5 = vld [vmem:[#allocation2 + $0xdc0] sm:$0xff]  ;;  %783 = vmatpush.msrb.mxu1 %v515_v4  ;;  %v200_v4 = vld [vmem:[#allocation2 + $0x1e8] sm:$0xff]  ;;  %738 = vmatmul.f32.vlgmr.msra.gmra.mxu2 %v2149_v3 }
  0x67   :  { %v647_v6 = vld [vmem:[#allocation2 + $0xfe0] sm:$0xff]  ;;  %803 = vmatpush.msrb.mxu2 %v579_v5  ;;  %v264_v5 = vld [vmem:[#allocation2 + $0x3e8] sm:$0xff] }
  0x68   :  { %v447_v7 = vld [vmem:[#allocation2 + $0x9a0] sm:$0xff]  ;;  %822 = vmatpush.msrb.mxu3 %v647_v6  ;;  %v328_v6 = vld [vmem:[#allocation2 + $0x5e8] sm:$0xff] }
  0x69   :  { %v511_v8 = vld [vmem:[#allocation2 + $0xba0] sm:$0xff]  ;;  %764 = vmatpush.msrb.mxu0 %v447_v7 }
  0x6a   :  { %v575_v9 = vld [vmem:[#allocation2 + $0xda0] sm:$0xff]  ;;  %784 = vmatpush.msrb.mxu1 %v511_v8  ;;  %v196_v8 = vld [vmem:[#allocation2 + $0x1c8] sm:$0xff] }
  0x6b   :  { %v643_v10 = vld [vmem:[#allocation2 + $0xfc0] sm:$0xff]  ;;  %804 = vmatpush.msrb.mxu2 %v575_v9  ;;  %v2154_v9 = vld.sshfl [vmem:[#allocation1 + $0x18] sm:$0xff pattern:$0x73625140] }
  0x6c   :  { %v443_v11 = vld [vmem:[#allocation2 + $0x980] sm:$0xff]  ;;  %823 = vmatpush.msrb.mxu3 %v643_v10  ;;  %v260_v10 = vld [vmem:[#allocation2 + $0x3c8] sm:$0xff] }
  0x6d   :  { %v507_v12 = vld [vmem:[#allocation2 + $0xb80] sm:$0xff]  ;;  %765 = vmatpush.msrb.mxu0 %v443_v11  ;;  %v324_v11 = vld [vmem:[#allocation2 + $0x5c8] sm:$0xff]  ;;  %758 = vmatmul.f32.vlgmr.msra.gmra.mxu3 %v2154_v9 }
  0x6e   :  { %v571_v13 = vld [vmem:[#allocation2 + $0xd80] sm:$0xff]  ;;  %785 = vmatpush.msrb.mxu1 %v507_v12  ;;  %v392_v12 = vld [vmem:[#allocation2 + $0x7e8] sm:$0xff] }
  0x6f   :  { %v639_v14 = vld [vmem:[#allocation2 + $0xfa0] sm:$0xff]  ;;  %805 = vmatpush.msrb.mxu2 %v571_v13  ;;  %v192_v13 = vld [vmem:[#allocation2 + $0x1a8] sm:$0xff] }
  0x70   :  { %v439_v15 = vld [vmem:[#allocation2 + $0x960] sm:$0xff]  ;;  %824 = vmatpush.msrb.mxu3 %v639_v14  ;;  %v256_v14 = vld [vmem:[#allocation2 + $0x3a8] sm:$0xff] }
  0x71   :  { %v503_v16 = vld [vmem:[#allocation2 + $0xb60] sm:$0xff]  ;;  %766 = vmatpush.msrb.mxu0 %v439_v15  ;;  %v320_v15 = vld [vmem:[#allocation2 + $0x5a8] sm:$0xff] }
  0x72   :  { %v567_v17 = vld [vmem:[#allocation2 + $0xd60] sm:$0xff]  ;;  %786 = vmatpush.msrb.mxu1 %v503_v16  ;;  %v388_v16 = vld [vmem:[#allocation2 + $0x7c8] sm:$0xff] }
  0x73   :  { %v635_v18 = vld [vmem:[#allocation2 + $0xf80] sm:$0xff]  ;;  %806 = vmatpush.msrb.mxu2 %v567_v17  ;;  %v188_v17 = vld [vmem:[#allocation2 + $0x188] sm:$0xff] }
  0x74   :  { %v435_v19 = vld [vmem:[#allocation2 + $0x940] sm:$0xff]  ;;  %825 = vmatpush.msrb.mxu3 %v635_v18  ;;  %v252_v18 = vld [vmem:[#allocation2 + $0x388] sm:$0xff] }
  0x75   :  { %v499_v20 = vld [vmem:[#allocation2 + $0xb40] sm:$0xff]  ;;  %767 = vmatpush.msrb.mxu0 %v435_v19  ;;  %v316_v19 = vld [vmem:[#allocation2 + $0x588] sm:$0xff] }
  0x76   :  { %v563_v21 = vld [vmem:[#allocation2 + $0xd40] sm:$0xff]  ;;  %787 = vmatpush.msrb.mxu1 %v499_v20  ;;  %v384_v20 = vld [vmem:[#allocation2 + $0x7a8] sm:$0xff] }
  0x77   :  { %v631_v22 = vld [vmem:[#allocation2 + $0xf60] sm:$0xff]  ;;  %807 = vmatpush.msrb.mxu2 %v563_v21 }
  0x78   :  { %v431_v23 = vld [vmem:[#allocation2 + $0x920] sm:$0xff]  ;;  %826 = vmatpush.msrb.mxu3 %v631_v22  ;;  %v184_v22 = vld [vmem:[#allocation2 + $0x168] sm:$0xff] }
  0x79   :  { %v495_v24 = vld [vmem:[#allocation2 + $0xb20] sm:$0xff]  ;;  %768 = vmatpush.msrb.mxu0 %v431_v23  ;;  %v248_v23 = vld [vmem:[#allocation2 + $0x368] sm:$0xff] }
  0x7a   :  { %v559_v26 = vld [vmem:[#allocation2 + $0xd20] sm:$0xff]  ;;  %788 = vmatpush.msrb.mxu1 %v495_v24  ;;  %v312_v24 = vld [vmem:[#allocation2 + $0x568] sm:$0xff] }
  0x7b   :  { %v627_v27 = vld [vmem:[#allocation2 + $0xf40] sm:$0xff]  ;;  %808 = vmatpush.msrb.mxu2 %v559_v26 }
  0x7c   :  { %v427_v28 = vld [vmem:[#allocation2 + $0x900] sm:$0xff]  ;;  %827 = vmatpush.msrb.mxu3 %v627_v27 }
  0x7d   :  { %v491_v29 = vld [vmem:[#allocation2 + $0xb00] sm:$0xff]  ;;  %769 = vmatpush.msrb.mxu0 %v427_v28  ;;  %v180_v28 = vld [vmem:[#allocation2 + $0x148] sm:$0xff] }
  0x7e   :  { %v555_v30 = vld [vmem:[#allocation2 + $0xd00] sm:$0xff]  ;;  %789 = vmatpush.msrb.mxu1 %v491_v29  ;;  %v244_v29 = vld [vmem:[#allocation2 + $0x348] sm:$0xff] }
  0x7f   :  { %v623_v31 = vld [vmem:[#allocation2 + $0xf20] sm:$0xff]  ;;  %809 = vmatpush.msrb.mxu2 %v555_v30  ;;  %v308_v30 = vld [vmem:[#allocation2 + $0x548] sm:$0xff] }
  0x80   :  { %v423_v32 = vld [vmem:[#allocation2 + $0x8e0] sm:$0xff]  ;;  %828 = vmatpush.msrb.mxu3 %v623_v31  ;;  %v376_v31 = vld [vmem:[#allocation2 + $0x768] sm:$0xff] }
  0x81   :  { %v487_v33 = vld [vmem:[#allocation2 + $0xae0] sm:$0xff]  ;;  %770 = vmatpush.msrb.mxu0 %v423_v32 }
  0x82   :  { %v551_v34 = vld [vmem:[#allocation2 + $0xce0] sm:$0xff]  ;;  %790 = vmatpush.msrb.mxu1 %v487_v33  ;;  %v176_v33 = vld [vmem:[#allocation2 + $0x128] sm:$0xff] }
  0x83   :  { %v619_v35 = vld [vmem:[#allocation2 + $0xf00] sm:$0xff]  ;;  %810 = vmatpush.msrb.mxu2 %v551_v34  ;;  %v240_v34 = vld [vmem:[#allocation2 + $0x328] sm:$0xff] }
  0x84   :  { %v419_v36 = vld [vmem:[#allocation2 + $0x8c0] sm:$0xff]  ;;  %829 = vmatpush.msrb.mxu3 %v619_v35  ;;  %v304_v35 = vld [vmem:[#allocation2 + $0x528] sm:$0xff] }
  0x85   :  { %v483_v37 = vld [vmem:[#allocation2 + $0xac0] sm:$0xff]  ;;  %771 = vmatpush.msrb.mxu0 %v419_v36  ;;  %v372_v36 = vld [vmem:[#allocation2 + $0x748] sm:$0xff] }
  0x86   :  { %v138_v38 = vld [vmem:[%s2293_s0 + $0x8] sm:$0xff]  ;;  %791 = vmatpush.msrb.mxu1 %v483_v37  ;;  %v172_v37 = vld [vmem:[#allocation2 + $0x108] sm:$0xff] }
  0x87   :  { %v547_v39 = vld [vmem:[#allocation2 + $0xcc0] sm:$0xff]  ;;  %665 = vst [vmem:[#allocation1 + $0x20] ss:$4 sm:$0xff] %v138_v38  ;;  %v236_v38 = vld [vmem:[#allocation2 + $0x308] sm:$0xff] }
  0x88   :  { %v615_v40 = vld [vmem:[#allocation2 + $0xee0] sm:$0xff]  ;;  %811 = vmatpush.msrb.mxu2 %v547_v39  ;;  %v300_v39 = vld [vmem:[#allocation2 + $0x508] sm:$0xff] }
  0x89   :  { %v415_v41 = vld [vmem:[#allocation2 + $0x8a0] sm:$0xff]  ;;  %830 = vmatpush.msrb.mxu3 %v615_v40  ;;  %v368_v40 = vld [vmem:[#allocation2 + $0x728] sm:$0xff] }
  0x8a   :  { %v479_v42 = vld [vmem:[#allocation2 + $0xaa0] sm:$0xff]  ;;  %772 = vmatpush.msrb.mxu0 %v415_v41  ;;  %v168_v41 = vld [vmem:[#allocation2 + $0xe8] sm:$0xff] }
  0x8b   :  { %v543_v43 = vld [vmem:[#allocation2 + $0xca0] sm:$0xff]  ;;  %792 = vmatpush.msrb.mxu1 %v479_v42  ;;  %v232_v42 = vld [vmem:[#allocation2 + $0x2e8] sm:$0xff] }
  0x8c   :  { %v611_v44 = vld [vmem:[#allocation2 + $0xec0] sm:$0xff]  ;;  %812 = vmatpush.msrb.mxu2 %v543_v43  ;;  %v296_v43 = vld [vmem:[#allocation2 + $0x4e8] sm:$0xff] }
  0x8d   :  { %v411_v45 = vld [vmem:[#allocation2 + $0x880] sm:$0xff]  ;;  %831 = vmatpush.msrb.mxu3 %v611_v44  ;;  %v364_v44 = vld [vmem:[#allocation2 + $0x708] sm:$0xff] }
  0x8e   :  { %v475_v46 = vld [vmem:[#allocation2 + $0xa80] sm:$0xff]  ;;  %773 = vmatpush.msrb.mxu0 %v411_v45  ;;  %v2157_v21 = vld.sshfl [vmem:[#allocation1 + $0x30] sm:$0xff pattern:$0x73625140] }
  0x8f   :  { %v539_v47 = vld [vmem:[#allocation2 + $0xc80] sm:$0xff]  ;;  %793 = vmatpush.msrb.mxu1 %v475_v46  ;;  %v2159_v26 = vld.sshfl [vmem:[#allocation1 + $0x20] sm:$0xff pattern:$0x73625140]  ;;  %v164_v45 = vld [vmem:[#allocation2 + $0xc8] sm:$0xff] }
  0x90   :  { %v607_v48 = vld [vmem:[#allocation2 + $0xea0] sm:$0xff]  ;;  %813 = vmatpush.msrb.mxu2 %v539_v47  ;;  %v2162_v27 = vld.sshfl [vmem:[#allocation1 + $0x38] sm:$0xff pattern:$0x73625140]  ;;  %v228_v46 = vld [vmem:[#allocation2 + $0x2c8] sm:$0xff] }
  0x91   :  { %v407_v49 = vld [vmem:[#allocation2 + $0x860] sm:$0xff]  ;;  %832 = vmatpush.msrb.mxu3 %v607_v48  ;;  %v292_v47 = vld [vmem:[#allocation2 + $0x4c8] sm:$0xff] }
  0x92   :  { %v471_v50 = vld [vmem:[#allocation2 + $0xa60] sm:$0xff]  ;;  %774 = vmatpush.msrb.mxu0 %v407_v49  ;;  %v360_v48 = vld [vmem:[#allocation2 + $0x6e8] sm:$0xff] }
  0x93   :  { %v535_v51 = vld [vmem:[#allocation2 + $0xc60] sm:$0xff]  ;;  %794 = vmatpush.msrb.mxu1 %v471_v50  ;;  %v160_v49 = vld [vmem:[#allocation2 + $0xa8] sm:$0xff] }
  0x94   :  { %v603_v52 = vld [vmem:[#allocation2 + $0xe80] sm:$0xff]  ;;  %814 = vmatpush.msrb.mxu2 %v535_v51  ;;  %v224_v50 = vld [vmem:[#allocation2 + $0x2a8] sm:$0xff] }
  0x95   :  { %v403_v53 = vld [vmem:[#allocation2 + $0x840] sm:$0xff]  ;;  %833 = vmatpush.msrb.mxu3 %v603_v52  ;;  %v288_v51 = vld [vmem:[#allocation2 + $0x4a8] sm:$0xff] }
  0x96   :  { %v467_v54 = vld [vmem:[#allocation2 + $0xa40] sm:$0xff]  ;;  %775 = vmatpush.msrb.mxu0 %v403_v53  ;;  %v356_v52 = vld [vmem:[#allocation2 + $0x6c8] sm:$0xff] }
  0x97   :  { %v531_v55 = vld [vmem:[#allocation2 + $0xc40] sm:$0xff]  ;;  %795 = vmatpush.msrb.mxu1 %v467_v54  ;;  %v156_v53 = vld [vmem:[#allocation2 + $0x88] sm:$0xff] }
  0x98   :  { %v599_v56 = vld [vmem:[#allocation2 + $0xe60] sm:$0xff]  ;;  %815 = vmatpush.msrb.mxu2 %v531_v55  ;;  %v220_v54 = vld [vmem:[#allocation2 + $0x288] sm:$0xff] }
  0x99   :  { %v399_v57 = vld [vmem:[#allocation2 + $0x820] sm:$0xff]  ;;  %834 = vmatpush.msrb.mxu3 %v599_v56  ;;  %v284_v55 = vld [vmem:[#allocation2 + $0x488] sm:$0xff] }
  0x9a   :  { %v463_v58 = vld [vmem:[#allocation2 + $0xa20] sm:$0xff]  ;;  %776 = vmatpush.msrb.mxu0 %v399_v57  ;;  %v352_v56 = vld [vmem:[#allocation2 + $0x6a8] sm:$0xff] }
  0x9b   :  { %v527_v59 = vld [vmem:[#allocation2 + $0xc20] sm:$0xff]  ;;  %796 = vmatpush.msrb.mxu1 %v463_v58  ;;  %v152_v57 = vld [vmem:[#allocation2 + $0x68] sm:$0xff] }
  0x9c   :  { %v595_v60 = vld [vmem:[#allocation2 + $0xe40] sm:$0xff]  ;;  %816 = vmatpush.msrb.mxu2 %v527_v59  ;;  %v216_v58 = vld [vmem:[#allocation2 + $0x268] sm:$0xff] }
  0x9d   :  { %v395_v61 = vld [vmem:[#allocation2 + $0x800] sm:$0xff]  ;;  %835 = vmatpush.msrb.mxu3 %v595_v60  ;;  %v280_v59 = vld [vmem:[#allocation2 + $0x468] sm:$0xff] }
  0x9e   :  { %v459_v62 = vld [vmem:[#allocation2 + $0xa00] sm:$0xff]  ;;  %777 = vmatpush.msrb.mxu0 %v395_v61  ;;  %v348_v60 = vld [vmem:[#allocation2 + $0x688] sm:$0xff] }
  0x9f   :  { %v523_v63 = vld [vmem:[#allocation2 + $0xc00] sm:$0xff]  ;;  %797 = vmatpush.msrb.mxu1 %v459_v62  ;;  %778 = vmatmul.f32.vlgmr.msrb.gmra.mxu0 %v2159_v26  ;;  %v148_v61 = vld [vmem:[#allocation2 + $0x48] sm:$0xff] }
  0xa0   :  { %v591_v0 = vld [vmem:[#allocation2 + $0xe20] sm:$0xff]  ;;  %817 = vmatpush.msrb.mxu2 %v523_v63  ;;  %842 = vmatpush.msra.mxu0 %v200_v4  ;;  %v212_v62 = vld [vmem:[#allocation2 + $0x248] sm:$0xff] }
  0xa1   :  { %v2147_v2 = vld.sshfl [vmem:[#allocation1 + $0x8] sm:$0xff pattern:$0x73625140]  ;;  %836 = vmatpush.msrb.mxu3 %v591_v0  ;;  %818 = vmatmul.f32.vlgmr.msrb.gmra.mxu2 %v2157_v21  ;;  %v276_v63 = vld [vmem:[#allocation2 + $0x448] sm:$0xff] }
  0xa2   :  { %718 = vmatmul.f32.vlgmr.msra.gmra.mxu1 %v2147_v2  ;;  %v587_v7 = vld [vmem:[#allocation2 + $0xe00] sm:$0xff]  ;;  %882 = vmatpush.msra.mxu2 %v328_v6  ;;  %v344_v0 = vld [vmem:[#allocation2 + $0x668] sm:$0xff] }
  0xa3   :  { %862 = vmatpush.msra.mxu1 %v264_v5  ;;  %837 = vmatpush.msrb.mxu3 %v587_v7  ;;  %v2165_v32 = vld.sshfl [vmem:[#allocation1 + $0x28] sm:$0xff pattern:$0x73625140]  ;;  %v144_v4 = vld [vmem:[#allocation2 + $0x28] sm:$0xff] }
  0xa4   :  { %843 = vmatpush.msra.mxu0 %v196_v8  ;;  %883 = vmatpush.msra.mxu2 %v324_v11  ;;  %v208_v5 = vld [vmem:[#allocation2 + $0x228] sm:$0xff] }
  0xa5   :  { %863 = vmatpush.msra.mxu1 %v260_v10  ;;  %902 = vmatpush.msra.mxu3 %v392_v12  ;;  %v272_v6 = vld [vmem:[#allocation2 + $0x428] sm:$0xff] }
  0xa6   :  { %844 = vmatpush.msra.mxu0 %v192_v13  ;;  %884 = vmatpush.msra.mxu2 %v320_v15  ;;  %v340_v7 = vld [vmem:[#allocation2 + $0x648] sm:$0xff] }
  0xa7   :  { %864 = vmatpush.msra.mxu1 %v256_v14  ;;  %903 = vmatpush.msra.mxu3 %v388_v16  ;;  %v140_v8 = vld [vmem:[#allocation2 + $0x8] sm:$0xff] }
  0xa8   :  { %845 = vmatpush.msra.mxu0 %v188_v17  ;;  %885 = vmatpush.msra.mxu2 %v316_v19  ;;  %v204_v10 = vld [vmem:[#allocation2 + $0x208] sm:$0xff] }
  0xa9   :  { %865 = vmatpush.msra.mxu1 %v252_v18  ;;  %904 = vmatpush.msra.mxu3 %v384_v20  ;;  %v268_v11 = vld [vmem:[#allocation2 + $0x408] sm:$0xff] }
  0xaa   :  { %846 = vmatpush.msra.mxu0 %v184_v22  ;;  %886 = vmatpush.msra.mxu2 %v312_v24  ;;  %v336_v12 = vld [vmem:[#allocation2 + $0x628] sm:$0xff] }
  0xab   :  { %866 = vmatpush.msra.mxu1 %v248_v23  ;;  %905 = vmatpush.msra.mxu3 %v380_v25  ;;  %v456_v13 = vld [vmem:[#allocation2 + $0x9e8] sm:$0xff] }
  0xac   :  { %838 = vmatmul.f32.vlgmr.msrb.gmra.mxu3 %v2162_v27  ;;  %847 = vmatpush.msra.mxu0 %v180_v28  ;;  %v520_v14 = vld [vmem:[#allocation2 + $0xbe8] sm:$0xff] }
  0xad   :  { %867 = vmatpush.msra.mxu1 %v244_v29  ;;  %887 = vmatpush.msra.mxu2 %v308_v30  ;;  %v584_v15 = vld [vmem:[#allocation2 + $0xde8] sm:$0xff] }
  0xae   :  { %906 = vmatpush.msra.mxu3 %v376_v31  ;;  %798 = vmatmul.f32.vlgmr.msrb.gmra.mxu1 %v2165_v32  ;;  %v332_v16 = vld [vmem:[#allocation2 + $0x608] sm:$0xff] }
  0xaf   :  { %848 = vmatpush.msra.mxu0 %v176_v33  ;;  %868 = vmatpush.msra.mxu1 %v240_v34  ;;  %v452_v17 = vld [vmem:[#allocation2 + $0x9c8] sm:$0xff] }
  0xb0   :  { %888 = vmatpush.msra.mxu2 %v304_v35  ;;  %907 = vmatpush.msra.mxu3 %v372_v36  ;;  %v516_v18 = vld [vmem:[#allocation2 + $0xbc8] sm:$0xff] }
  0xb1   :  { %849 = vmatpush.msra.mxu0 %v172_v37  ;;  %869 = vmatpush.msra.mxu1 %v236_v38  ;;  %v580_v19 = vld [vmem:[#allocation2 + $0xdc8] sm:$0xff] }
  0xb2   :  { %889 = vmatpush.msra.mxu2 %v300_v39  ;;  %908 = vmatpush.msra.mxu3 %v368_v40  ;;  %v648_v20 = vld [vmem:[#allocation2 + $0xfe8] sm:$0xff] }
  0xb3   :  { %850 = vmatpush.msra.mxu0 %v168_v41  ;;  %870 = vmatpush.msra.mxu1 %v232_v42  ;;  %v448_v22 = vld [vmem:[#allocation2 + $0x9a8] sm:$0xff] }
  0xb4   :  { %890 = vmatpush.msra.mxu2 %v296_v43  ;;  %909 = vmatpush.msra.mxu3 %v364_v44  ;;  %v512_v23 = vld [vmem:[#allocation2 + $0xba8] sm:$0xff] }
  0xb5   :  { %851 = vmatpush.msra.mxu0 %v164_v45  ;;  %871 = vmatpush.msra.mxu1 %v228_v46  ;;  %v576_v24 = vld [vmem:[#allocation2 + $0xda8] sm:$0xff] }
  0xb6   :  { %891 = vmatpush.msra.mxu2 %v292_v47  ;;  %910 = vmatpush.msra.mxu3 %v360_v48  ;;  %v644_v25 = vld [vmem:[#allocation2 + $0xfc8] sm:$0xff] }
  0xb7   :  { %852 = vmatpush.msra.mxu0 %v160_v49  ;;  %872 = vmatpush.msra.mxu1 %v224_v50  ;;  %v444_v28 = vld [vmem:[#allocation2 + $0x988] sm:$0xff] }
  0xb8   :  { %892 = vmatpush.msra.mxu2 %v288_v51  ;;  %911 = vmatpush.msra.mxu3 %v356_v52  ;;  %v508_v29 = vld [vmem:[#allocation2 + $0xb88] sm:$0xff] }
  0xb9   :  { %853 = vmatpush.msra.mxu0 %v156_v53  ;;  %873 = vmatpush.msra.mxu1 %v220_v54  ;;  %v572_v30 = vld [vmem:[#allocation2 + $0xd88] sm:$0xff] }
  0xba   :  { %893 = vmatpush.msra.mxu2 %v284_v55  ;;  %912 = vmatpush.msra.mxu3 %v352_v56  ;;  %v640_v31 = vld [vmem:[#allocation2 + $0xfa8] sm:$0xff] }
  0xbb   :  { %854 = vmatpush.msra.mxu0 %v152_v57  ;;  %874 = vmatpush.msra.mxu1 %v216_v58  ;;  %v440_v33 = vld [vmem:[#allocation2 + $0x968] sm:$0xff] }
  0xbc   :  { %894 = vmatpush.msra.mxu2 %v280_v59  ;;  %913 = vmatpush.msra.mxu3 %v348_v60  ;;  %v504_v34 = vld [vmem:[#allocation2 + $0xb68] sm:$0xff] }
  0xbd   :  { %855 = vmatpush.msra.mxu0 %v148_v61  ;;  %875 = vmatpush.msra.mxu1 %v212_v62  ;;  %v568_v35 = vld [vmem:[#allocation2 + $0xd68] sm:$0xff] }
  0xbe   :  { %895 = vmatpush.msra.mxu2 %v276_v63  ;;  %914 = vmatpush.msra.mxu3 %v344_v0  ;;  %v636_v36 = vld [vmem:[#allocation2 + $0xf88] sm:$0xff] }
  0xbf   :  { %856 = vmatpush.msra.mxu0 %v144_v4  ;;  %876 = vmatpush.msra.mxu1 %v208_v5  ;;  %v436_v37 = vld [vmem:[#allocation2 + $0x948] sm:$0xff] }
  0xc0   :  { %896 = vmatpush.msra.mxu2 %v272_v6  ;;  %915 = vmatpush.msra.mxu3 %v340_v7  ;;  %v500_v38 = vld [vmem:[#allocation2 + $0xb48] sm:$0xff] }
  0xc1   :  { %857 = vmatpush.msra.mxu0 %v140_v8  ;;  %877 = vmatpush.msra.mxu1 %v204_v10  ;;  %v564_v39 = vld [vmem:[#allocation2 + $0xd48] sm:$0xff] }
  0xc2   :  { %897 = vmatpush.msra.mxu2 %v268_v11  ;;  %916 = vmatpush.msra.mxu3 %v336_v12  ;;  %v632_v40 = vld [vmem:[#allocation2 + $0xf68] sm:$0xff] }
  0xc3   :  { %922 = vmatpush.msrb.mxu0 %v456_v13  ;;  %942 = vmatpush.msrb.mxu1 %v520_v14  ;;  %v432_v41 = vld [vmem:[#allocation2 + $0x928] sm:$0xff] }
  0xc4   :  { %962 = vmatpush.msrb.mxu2 %v584_v15  ;;  %917 = vmatpush.msra.mxu3 %v332_v16  ;;  %v496_v42 = vld [vmem:[#allocation2 + $0xb28] sm:$0xff] }
  0xc5   :  { %923 = vmatpush.msrb.mxu0 %v452_v17  ;;  %943 = vmatpush.msrb.mxu1 %v516_v18  ;;  %v560_v43 = vld [vmem:[#allocation2 + $0xd28] sm:$0xff] }
  0xc6   :  { %963 = vmatpush.msrb.mxu2 %v580_v19  ;;  %982 = vmatpush.msrb.mxu3 %v648_v20  ;;  %v628_v44 = vld [vmem:[#allocation2 + $0xf48] sm:$0xff] }
  0xc7   :  { %924 = vmatpush.msrb.mxu0 %v448_v22  ;;  %944 = vmatpush.msrb.mxu1 %v512_v23  ;;  %v428_v45 = vld [vmem:[#allocation2 + $0x908] sm:$0xff]  ;;  %v201_v22 = vld [vmem:[#allocation2 + $0x1f0] sm:$0xff] }
  0xc8   :  { %964 = vmatpush.msrb.mxu2 %v576_v24  ;;  %983 = vmatpush.msrb.mxu3 %v644_v25  ;;  %v492_v46 = vld [vmem:[#allocation2 + $0xb08] sm:$0xff]  ;;  %v265_v23 = vld [vmem:[#allocation2 + $0x3f0] sm:$0xff] }
  0xc9   :  { %925 = vmatpush.msrb.mxu0 %v444_v28  ;;  %945 = vmatpush.msrb.mxu1 %v508_v29  ;;  %v556_v47 = vld [vmem:[#allocation2 + $0xd08] sm:$0xff]  ;;  %v329_v24 = vld [vmem:[#allocation2 + $0x5f0] sm:$0xff] }
  0xca   :  { %965 = vmatpush.msrb.mxu2 %v572_v30  ;;  %984 = vmatpush.msrb.mxu3 %v640_v31  ;;  %v624_v48 = vld [vmem:[#allocation2 + $0xf28] sm:$0xff]  ;;  %v197_v28 = vld [vmem:[#allocation2 + $0x1d0] sm:$0xff] }
  0xcb   :  { %926 = vmatpush.msrb.mxu0 %v440_v33  ;;  %946 = vmatpush.msrb.mxu1 %v504_v34  ;;  %v424_v49 = vld [vmem:[#allocation2 + $0x8e8] sm:$0xff]  ;;  %v261_v29 = vld [vmem:[#allocation2 + $0x3d0] sm:$0xff] }
  0xcc   :  { %966 = vmatpush.msrb.mxu2 %v568_v35  ;;  %985 = vmatpush.msrb.mxu3 %v636_v36  ;;  %v488_v50 = vld [vmem:[#allocation2 + $0xae8] sm:$0xff]  ;;  %v325_v30 = vld [vmem:[#allocation2 + $0x5d0] sm:$0xff] }
  0xcd   :  { %927 = vmatpush.msrb.mxu0 %v436_v37  ;;  %947 = vmatpush.msrb.mxu1 %v500_v38  ;;  %v552_v51 = vld [vmem:[#allocation2 + $0xce8] sm:$0xff]  ;;  %v393_v31 = vld [vmem:[#allocation2 + $0x7f0] sm:$0xff] }
  0xce   :  { %967 = vmatpush.msrb.mxu2 %v564_v39  ;;  %986 = vmatpush.msrb.mxu3 %v632_v40  ;;  %v620_v52 = vld [vmem:[#allocation2 + $0xf08] sm:$0xff]  ;;  %v193_v33 = vld [vmem:[#allocation2 + $0x1b0] sm:$0xff] }
  0xcf   :  { %928 = vmatpush.msrb.mxu0 %v432_v41  ;;  %948 = vmatpush.msrb.mxu1 %v496_v42  ;;  %v420_v53 = vld [vmem:[#allocation2 + $0x8c8] sm:$0xff]  ;;  %v257_v34 = vld [vmem:[#allocation2 + $0x3b0] sm:$0xff] }
  0xd0   :  { %968 = vmatpush.msrb.mxu2 %v560_v43  ;;  %987 = vmatpush.msrb.mxu3 %v628_v44  ;;  %v484_v54 = vld [vmem:[#allocation2 + $0xac8] sm:$0xff]  ;;  %v389_v35 = vld [vmem:[#allocation2 + $0x7d0] sm:$0xff] }
  0xd1   :  { %929 = vmatpush.msrb.mxu0 %v428_v45  ;;  %949 = vmatpush.msrb.mxu1 %v492_v46  ;;  %v548_v55 = vld [vmem:[#allocation2 + $0xcc8] sm:$0xff]  ;;  %v253_v36 = vld [vmem:[#allocation2 + $0x390] sm:$0xff] }
  0xd2   :  { %969 = vmatpush.msrb.mxu2 %v556_v47  ;;  %988 = vmatpush.msrb.mxu3 %v624_v48  ;;  %v616_v56 = vld [vmem:[#allocation2 + $0xee8] sm:$0xff]  ;;  %v317_v37 = vld [vmem:[#allocation2 + $0x590] sm:$0xff] }
  0xd3   :  { %930 = vmatpush.msrb.mxu0 %v424_v49  ;;  %950 = vmatpush.msrb.mxu1 %v488_v50  ;;  %v416_v57 = vld [vmem:[#allocation2 + $0x8a8] sm:$0xff]  ;;  %v385_v38 = vld [vmem:[#allocation2 + $0x7b0] sm:$0xff] }
  0xd4   :  { %970 = vmatpush.msrb.mxu2 %v552_v51  ;;  %989 = vmatpush.msrb.mxu3 %v620_v52  ;;  %v480_v58 = vld [vmem:[#allocation2 + $0xaa8] sm:$0xff]  ;;  %v185_v39 = vld [vmem:[#allocation2 + $0x170] sm:$0xff] }
  0xd5   :  { %931 = vmatpush.msrb.mxu0 %v420_v53  ;;  %951 = vmatpush.msrb.mxu1 %v484_v54  ;;  %v544_v59 = vld [vmem:[#allocation2 + $0xca8] sm:$0xff]  ;;  %v249_v40 = vld [vmem:[#allocation2 + $0x370] sm:$0xff] }
  0xd6   :  { %v612_v60 = vld [vmem:[#allocation2 + $0xec8] sm:$0xff]  ;;  %971 = vmatpush.msrb.mxu2 %v548_v55  ;;  %990 = vmatpush.msrb.mxu3 %v616_v56  ;;  %v313_v41 = vld [vmem:[#allocation2 + $0x570] sm:$0xff] }
  0xd7   :  { %v412_v61 = vld [vmem:[#allocation2 + $0x888] sm:$0xff]  ;;  %932 = vmatpush.msrb.mxu0 %v416_v57  ;;  %952 = vmatpush.msrb.mxu1 %v480_v58  ;;  %v381_v42 = vld [vmem:[#allocation2 + $0x790] sm:$0xff] }
  0xd8   :  { %v476_v62 = vld [vmem:[#allocation2 + $0xa88] sm:$0xff]  ;;  %972 = vmatpush.msrb.mxu2 %v544_v59  ;;  %991 = vmatpush.msrb.mxu3 %v612_v60  ;;  %v181_v43 = vld [vmem:[#allocation2 + $0x150] sm:$0xff] }
  0xd9   :  { %v540_v63 = vld [vmem:[#allocation2 + $0xc88] sm:$0xff]  ;;  %933 = vmatpush.msrb.mxu0 %v412_v61  ;;  %953 = vmatpush.msrb.mxu1 %v476_v62  ;;  %v245_v44 = vld [vmem:[#allocation2 + $0x350] sm:$0xff] }
  0xda   :  { %v608_v0 = vld [vmem:[#allocation2 + $0xea8] sm:$0xff]  ;;  %973 = vmatpush.msrb.mxu2 %v540_v63  ;;  %858 = vmatmul.f32.vlgmr.msra.gmra.mxu0 %v2145_v1  ;;  %v321_v1 = vld [vmem:[#allocation2 + $0x5b0] sm:$0xff] }
  0xdb   :  { %v408_v4 = vld [vmem:[#allocation2 + $0x868] sm:$0xff]  ;;  %992 = vmatpush.msrb.mxu3 %v608_v0  ;;  %878 = vmatmul.f32.vlgmr.msra.gmra.mxu1 %v2147_v2  ;;  %v189_v2 = vld [vmem:[#allocation2 + $0x190] sm:$0xff] }
  0xdc   :  { %v472_v5 = vld [vmem:[#allocation2 + $0xa68] sm:$0xff]  ;;  %934 = vmatpush.msrb.mxu0 %v408_v4  ;;  %898 = vmatmul.f32.vlgmr.msra.gmra.mxu2 %v2149_v3  ;;  %v309_v45 = vld [vmem:[#allocation2 + $0x550] sm:$0xff] }
  0xdd   :  { %v536_v6 = vld [vmem:[#allocation2 + $0xc68] sm:$0xff]  ;;  %954 = vmatpush.msrb.mxu1 %v472_v5  ;;  %918 = vmatmul.f32.vlgmr.msra.gmra.mxu3 %v2154_v9  ;;  %v377_v46 = vld [vmem:[#allocation2 + $0x770] sm:$0xff] }
  0xde   :  { %v604_v7 = vld [vmem:[#allocation2 + $0xe88] sm:$0xff]  ;;  %974 = vmatpush.msrb.mxu2 %v536_v6  ;;  %v177_v47 = vld [vmem:[#allocation2 + $0x130] sm:$0xff] }
  0xdf   :  { %v404_v8 = vld [vmem:[#allocation2 + $0x848] sm:$0xff]  ;;  %993 = vmatpush.msrb.mxu3 %v604_v7  ;;  %v241_v48 = vld [vmem:[#allocation2 + $0x330] sm:$0xff] }
  0xe0   :  { %v468_v10 = vld [vmem:[#allocation2 + $0xa48] sm:$0xff]  ;;  %935 = vmatpush.msrb.mxu0 %v404_v8  ;;  %v305_v49 = vld [vmem:[#allocation2 + $0x530] sm:$0xff] }
  0xe1   :  { %v532_v11 = vld [vmem:[#allocation2 + $0xc48] sm:$0xff]  ;;  %955 = vmatpush.msrb.mxu1 %v468_v10  ;;  %v373_v50 = vld [vmem:[#allocation2 + $0x750] sm:$0xff] }
  0xe2   :  { %v600_v12 = vld [vmem:[#allocation2 + $0xe68] sm:$0xff]  ;;  %975 = vmatpush.msrb.mxu2 %v532_v11  ;;  %v173_v51 = vld [vmem:[#allocation2 + $0x110] sm:$0xff] }
  0xe3   :  { %v400_v13 = vld [vmem:[#allocation2 + $0x828] sm:$0xff]  ;;  %994 = vmatpush.msrb.mxu3 %v600_v12  ;;  %v237_v52 = vld [vmem:[#allocation2 + $0x310] sm:$0xff] }
  0xe4   :  { %v464_v14 = vld [vmem:[#allocation2 + $0xa28] sm:$0xff]  ;;  %936 = vmatpush.msrb.mxu0 %v400_v13  ;;  %v301_v53 = vld [vmem:[#allocation2 + $0x510] sm:$0xff] }
  0xe5   :  { %v528_v15 = vld [vmem:[#allocation2 + $0xc28] sm:$0xff]  ;;  %956 = vmatpush.msrb.mxu1 %v464_v14  ;;  %v369_v54 = vld [vmem:[#allocation2 + $0x730] sm:$0xff] }
  0xe6   :  { %v596_v16 = vld [vmem:[#allocation2 + $0xe48] sm:$0xff]  ;;  %976 = vmatpush.msrb.mxu2 %v528_v15  ;;  %v169_v55 = vld [vmem:[#allocation2 + $0xf0] sm:$0xff] }
  0xe7   :  { %v396_v17 = vld [vmem:[#allocation2 + $0x808] sm:$0xff]  ;;  %995 = vmatpush.msrb.mxu3 %v596_v16  ;;  %v233_v56 = vld [vmem:[#allocation2 + $0x2f0] sm:$0xff] }
  0xe8   :  { %v460_v18 = vld [vmem:[#allocation2 + $0xa08] sm:$0xff]  ;;  %937 = vmatpush.msrb.mxu0 %v396_v17  ;;  %v297_v57 = vld [vmem:[#allocation2 + $0x4f0] sm:$0xff] }
  0xe9   :  { %v524_v19 = vld [vmem:[#allocation2 + $0xc08] sm:$0xff]  ;;  %957 = vmatpush.msrb.mxu1 %v460_v18  ;;  %938 = vmatmul.f32.vlgmr.msrb.gmra.mxu0 %v2159_v26  ;;  %v365_v58 = vld [vmem:[#allocation2 + $0x710] sm:$0xff] }
  0xea   :  { %v592_v20 = vld [vmem:[#allocation2 + $0xe28] sm:$0xff]  ;;  %977 = vmatpush.msrb.mxu2 %v524_v19  ;;  %1002 = vmatpush.msra.mxu0 %v201_v22  ;;  %v165_v59 = vld [vmem:[#allocation2 + $0xd0] sm:$0xff] }
  0xeb   :  { %996 = vmatpush.msrb.mxu3 %v592_v20  ;;  %v588_v25 = vld [vmem:[#allocation2 + $0xe08] sm:$0xff]  ;;  %1022 = vmatpush.msra.mxu1 %v265_v23  ;;  %v229_v60 = vld [vmem:[#allocation2 + $0x2d0] sm:$0xff] }
  0xec   :  { %1042 = vmatpush.msra.mxu2 %v329_v24  ;;  %1003 = vmatpush.msra.mxu0 %v197_v28  ;;  %v293_v61 = vld [vmem:[#allocation2 + $0x4d0] sm:$0xff] }
  0xed   :  { %997 = vmatpush.msrb.mxu3 %v588_v25  ;;  %1023 = vmatpush.msra.mxu1 %v261_v29  ;;  %v361_v62 = vld [vmem:[#allocation2 + $0x6f0] sm:$0xff] }
  0xee   :  { %1043 = vmatpush.msra.mxu2 %v325_v30  ;;  %1004 = vmatpush.msra.mxu0 %v193_v33  ;;  %v161_v63 = vld [vmem:[#allocation2 + $0xb0] sm:$0xff] }
  0xef   :  { %1062 = vmatpush.msra.mxu3 %v393_v31  ;;  %1024 = vmatpush.msra.mxu1 %v257_v34  ;;  %v225_v0 = vld [vmem:[#allocation2 + $0x2b0] sm:$0xff] }
  0xf0   :  { %1044 = vmatpush.msra.mxu2 %v321_v1  ;;  %1005 = vmatpush.msra.mxu0 %v189_v2  ;;  %v289_v4 = vld [vmem:[#allocation2 + $0x4b0] sm:$0xff] }
  0xf1   :  { %1063 = vmatpush.msra.mxu3 %v389_v35  ;;  %1025 = vmatpush.msra.mxu1 %v253_v36  ;;  %v357_v5 = vld [vmem:[#allocation2 + $0x6d0] sm:$0xff] }
  0xf2   :  { %1045 = vmatpush.msra.mxu2 %v317_v37  ;;  %1006 = vmatpush.msra.mxu0 %v185_v39  ;;  %v157_v6 = vld [vmem:[#allocation2 + $0x90] sm:$0xff] }
  0xf3   :  { %1064 = vmatpush.msra.mxu3 %v385_v38  ;;  %978 = vmatmul.f32.vlgmr.msrb.gmra.mxu2 %v2157_v21  ;;  %v221_v7 = vld [vmem:[#allocation2 + $0x290] sm:$0xff] }
  0xf4   :  { %1026 = vmatpush.msra.mxu1 %v249_v40  ;;  %1046 = vmatpush.msra.mxu2 %v313_v41  ;;  %v285_v8 = vld [vmem:[#allocation2 + $0x490] sm:$0xff] }
  0xf5   :  { %1065 = vmatpush.msra.mxu3 %v381_v42  ;;  %1007 = vmatpush.msra.mxu0 %v181_v43  ;;  %v353_v10 = vld [vmem:[#allocation2 + $0x6b0] sm:$0xff] }
  0xf6   :  { %998 = vmatmul.f32.vlgmr.msrb.gmra.mxu3 %v2162_v27  ;;  %1027 = vmatpush.msra.mxu1 %v245_v44  ;;  %v153_v11 = vld [vmem:[#allocation2 + $0x70] sm:$0xff] }
  0xf7   :  { %1047 = vmatpush.msra.mxu2 %v309_v45  ;;  %1066 = vmatpush.msra.mxu3 %v377_v46  ;;  %v217_v12 = vld [vmem:[#allocation2 + $0x270] sm:$0xff] }
  0xf8   :  { %958 = vmatmul.f32.vlgmr.msrb.gmra.mxu1 %v2165_v32  ;;  %1008 = vmatpush.msra.mxu0 %v177_v47  ;;  %v281_v13 = vld [vmem:[#allocation2 + $0x470] sm:$0xff] }
  0xf9   :  { %1028 = vmatpush.msra.mxu1 %v241_v48  ;;  %1048 = vmatpush.msra.mxu2 %v305_v49  ;;  %v349_v14 = vld [vmem:[#allocation2 + $0x690] sm:$0xff] }
  0xfa   :  { %1067 = vmatpush.msra.mxu3 %v373_v50  ;;  %1009 = vmatpush.msra.mxu0 %v173_v51  ;;  %v149_v15 = vld [vmem:[#allocation2 + $0x50] sm:$0xff] }
  0xfb   :  { %1029 = vmatpush.msra.mxu1 %v237_v52  ;;  %1049 = vmatpush.msra.mxu2 %v301_v53  ;;  %v213_v16 = vld [vmem:[#allocation2 + $0x250] sm:$0xff] }
  0xfc   :  { %1068 = vmatpush.msra.mxu3 %v369_v54  ;;  %1010 = vmatpush.msra.mxu0 %v169_v55  ;;  %v277_v17 = vld [vmem:[#allocation2 + $0x450] sm:$0xff] }
  0xfd   :  { %1030 = vmatpush.msra.mxu1 %v233_v56  ;;  %1050 = vmatpush.msra.mxu2 %v297_v57  ;;  %v345_v18 = vld [vmem:[#allocation2 + $0x670] sm:$0xff] }
  0xfe   :  { %1069 = vmatpush.msra.mxu3 %v365_v58  ;;  %1011 = vmatpush.msra.mxu0 %v165_v59  ;;  %v145_v19 = vld [vmem:[#allocation2 + $0x30] sm:$0xff] }
  0xff   :  { %1031 = vmatpush.msra.mxu1 %v229_v60  ;;  %1051 = vmatpush.msra.mxu2 %v293_v61  ;;  %v209_v20 = vld [vmem:[#allocation2 + $0x230] sm:$0xff] }
 0x100   :  { %1070 = vmatpush.msra.mxu3 %v361_v62  ;;  %1012 = vmatpush.msra.mxu0 %v161_v63  ;;  %v273_v22 = vld [vmem:[#allocation2 + $0x430] sm:$0xff] }
 0x101   :  { %1032 = vmatpush.msra.mxu1 %v225_v0  ;;  %1052 = vmatpush.msra.mxu2 %v289_v4  ;;  %v341_v23 = vld [vmem:[#allocation2 + $0x650] sm:$0xff] }
 0x102   :  { %1071 = vmatpush.msra.mxu3 %v357_v5  ;;  %1013 = vmatpush.msra.mxu0 %v157_v6  ;;  %v141_v24 = vld [vmem:[#allocation2 + $0x10] sm:$0xff] }
 0x103   :  { %1033 = vmatpush.msra.mxu1 %v221_v7  ;;  %1053 = vmatpush.msra.mxu2 %v285_v8  ;;  %v205_v25 = vld [vmem:[#allocation2 + $0x210] sm:$0xff] }
 0x104   :  { %1072 = vmatpush.msra.mxu3 %v353_v10  ;;  %1014 = vmatpush.msra.mxu0 %v153_v11  ;;  %v269_v28 = vld [vmem:[#allocation2 + $0x410] sm:$0xff] }
 0x105   :  { %1034 = vmatpush.msra.mxu1 %v217_v12  ;;  %1054 = vmatpush.msra.mxu2 %v281_v13  ;;  %v337_v29 = vld [vmem:[#allocation2 + $0x630] sm:$0xff] }
 0x106   :  { %1073 = vmatpush.msra.mxu3 %v349_v14  ;;  %1015 = vmatpush.msra.mxu0 %v149_v15  ;;  %v457_v30 = vld [vmem:[#allocation2 + $0x9f0] sm:$0xff] }
 0x107   :  { %1035 = vmatpush.msra.mxu1 %v213_v16  ;;  %1055 = vmatpush.msra.mxu2 %v277_v17  ;;  %v521_v31 = vld [vmem:[#allocation2 + $0xbf0] sm:$0xff] }
 0x108   :  { %1074 = vmatpush.msra.mxu3 %v345_v18  ;;  %1016 = vmatpush.msra.mxu0 %v145_v19  ;;  %v585_v33 = vld [vmem:[#allocation2 + $0xdf0] sm:$0xff] }
 0x109   :  { %1036 = vmatpush.msra.mxu1 %v209_v20  ;;  %1056 = vmatpush.msra.mxu2 %v273_v22  ;;  %v333_v34 = vld [vmem:[#allocation2 + $0x610] sm:$0xff] }
 0x10a   :  { %1075 = vmatpush.msra.mxu3 %v341_v23  ;;  %1017 = vmatpush.msra.mxu0 %v141_v24  ;;  %v453_v1 = vld [vmem:[#allocation2 + $0x9d0] sm:$0xff] }
 0x10b   :  { %1037 = vmatpush.msra.mxu1 %v205_v25  ;;  %1057 = vmatpush.msra.mxu2 %v269_v28  ;;  %v517_v35 = vld [vmem:[#allocation2 + $0xbd0] sm:$0xff]  ;;  %v2178_v25 = vld.sshfl [vmem:[#allocation1] sm:$0xff pattern:$0x73625140] }
 0x10c   :  { %1076 = vmatpush.msra.mxu3 %v337_v29  ;;  %1082 = vmatpush.msrb.mxu0 %v457_v30  ;;  %v581_v2 = vld [vmem:[#allocation2 + $0xdd0] sm:$0xff] }
 0x10d   :  { %1102 = vmatpush.msrb.mxu1 %v521_v31  ;;  %v649_v36 = vld [vmem:[#allocation2 + $0xff0] sm:$0xff]  ;;  %1122 = vmatpush.msrb.mxu2 %v585_v33  ;;  %v2182_v33 = vld.sshfl [vmem:[#allocation1 + $0x8] sm:$0xff pattern:$0x73625140] }
 0x10e   :  { %1077 = vmatpush.msra.mxu3 %v333_v34  ;;  %v449_v37 = vld [vmem:[#allocation2 + $0x9b0] sm:$0xff]  ;;  %1083 = vmatpush.msrb.mxu0 %v453_v1 }
 0x10f   :  { %v513_v38 = vld [vmem:[#allocation2 + $0xbb0] sm:$0xff]  ;;  %1103 = vmatpush.msrb.mxu1 %v517_v35  ;;  %1123 = vmatpush.msrb.mxu2 %v581_v2 }
 0x110   :  { %v577_v39 = vld [vmem:[#allocation2 + $0xdb0] sm:$0xff]  ;;  %1142 = vmatpush.msrb.mxu3 %v649_v36  ;;  %1084 = vmatpush.msrb.mxu0 %v449_v37  ;;  %v266_v36 = vld [vmem:[#allocation2 + $0x3f8] sm:$0xff] }
 0x111   :  { %v645_v40 = vld [vmem:[#allocation2 + $0xfd0] sm:$0xff]  ;;  %1104 = vmatpush.msrb.mxu1 %v513_v38  ;;  %1124 = vmatpush.msrb.mxu2 %v577_v39  ;;  %v330_v37 = vld [vmem:[#allocation2 + $0x5f8] sm:$0xff] }
 0x112   :  { %v445_v41 = vld [vmem:[#allocation2 + $0x990] sm:$0xff]  ;;  %1143 = vmatpush.msrb.mxu3 %v645_v40  ;;  %1058 = vmatmul.f32.vlgmr.msra.gmra.mxu2 %v2149_v3  ;;  %v198_v39 = vld [vmem:[#allocation2 + $0x1d8] sm:$0xff] }
 0x113   :  { %v509_v42 = vld [vmem:[#allocation2 + $0xb90] sm:$0xff]  ;;  %1085 = vmatpush.msrb.mxu0 %v445_v41  ;;  %1078 = vmatmul.f32.vlgmr.msra.gmra.mxu3 %v2154_v9  ;;  %v202_v9 = vld [vmem:[#allocation2 + $0x1f8] sm:$0xff] }
 0x114   :  { %v573_v43 = vld [vmem:[#allocation2 + $0xd90] sm:$0xff]  ;;  %1105 = vmatpush.msrb.mxu1 %v509_v42  ;;  %1018 = vmatmul.f32.vlgmr.msra.gmra.mxu0 %v2178_v25  ;;  %v262_v40 = vld [vmem:[#allocation2 + $0x3d8] sm:$0xff] }
 0x115   :  { %v641_v44 = vld [vmem:[#allocation2 + $0xfb0] sm:$0xff]  ;;  %1125 = vmatpush.msrb.mxu2 %v573_v43  ;;  %1038 = vmatmul.f32.vlgmr.msra.gmra.mxu1 %v2182_v33  ;;  %v326_v41 = vld [vmem:[#allocation2 + $0x5d8] sm:$0xff] }
 0x116   :  { %v441_v45 = vld [vmem:[#allocation2 + $0x970] sm:$0xff]  ;;  %1144 = vmatpush.msrb.mxu3 %v641_v44  ;;  %v394_v42 = vld [vmem:[#allocation2 + $0x7f8] sm:$0xff] }
 0x117   :  { %v505_v46 = vld [vmem:[#allocation2 + $0xb70] sm:$0xff]  ;;  %1086 = vmatpush.msrb.mxu0 %v441_v45  ;;  %v194_v43 = vld [vmem:[#allocation2 + $0x1b8] sm:$0xff] }
 0x118   :  { %v569_v47 = vld [vmem:[#allocation2 + $0xd70] sm:$0xff]  ;;  %1106 = vmatpush.msrb.mxu1 %v505_v46  ;;  %v258_v44 = vld [vmem:[#allocation2 + $0x3b8] sm:$0xff] }
 0x119   :  { %v637_v48 = vld [vmem:[#allocation2 + $0xf90] sm:$0xff]  ;;  %1126 = vmatpush.msrb.mxu2 %v569_v47  ;;  %v322_v45 = vld [vmem:[#allocation2 + $0x5b8] sm:$0xff] }
 0x11a   :  { %v437_v49 = vld [vmem:[#allocation2 + $0x950] sm:$0xff]  ;;  %1145 = vmatpush.msrb.mxu3 %v637_v48  ;;  %v390_v46 = vld [vmem:[#allocation2 + $0x7d8] sm:$0xff] }
 0x11b   :  { %v501_v50 = vld [vmem:[#allocation2 + $0xb50] sm:$0xff]  ;;  %1087 = vmatpush.msrb.mxu0 %v437_v49  ;;  %v254_v47 = vld [vmem:[#allocation2 + $0x398] sm:$0xff] }
 0x11c   :  { %v565_v51 = vld [vmem:[#allocation2 + $0xd50] sm:$0xff]  ;;  %1107 = vmatpush.msrb.mxu1 %v501_v50  ;;  %v318_v48 = vld [vmem:[#allocation2 + $0x598] sm:$0xff] }
 0x11d   :  { %v633_v52 = vld [vmem:[#allocation2 + $0xf70] sm:$0xff]  ;;  %1127 = vmatpush.msrb.mxu2 %v565_v51  ;;  %v386_v49 = vld [vmem:[#allocation2 + $0x7b8] sm:$0xff] }
 0x11e   :  { %v433_v53 = vld [vmem:[#allocation2 + $0x930] sm:$0xff]  ;;  %1146 = vmatpush.msrb.mxu3 %v633_v52  ;;  %v314_v50 = vld [vmem:[#allocation2 + $0x578] sm:$0xff] }
 0x11f   :  { %v497_v54 = vld [vmem:[#allocation2 + $0xb30] sm:$0xff]  ;;  %1088 = vmatpush.msrb.mxu0 %v433_v53  ;;  %v382_v51 = vld [vmem:[#allocation2 + $0x798] sm:$0xff] }
 0x120   :  { %v561_v55 = vld [vmem:[#allocation2 + $0xd30] sm:$0xff]  ;;  %1108 = vmatpush.msrb.mxu1 %v497_v54  ;;  %v182_v52 = vld [vmem:[#allocation2 + $0x158] sm:$0xff] }
 0x121   :  { %v629_v56 = vld [vmem:[#allocation2 + $0xf50] sm:$0xff]  ;;  %1128 = vmatpush.msrb.mxu2 %v561_v55  ;;  %v246_v53 = vld [vmem:[#allocation2 + $0x358] sm:$0xff] }
 0x122   :  { %v429_v57 = vld [vmem:[#allocation2 + $0x910] sm:$0xff]  ;;  %1147 = vmatpush.msrb.mxu3 %v629_v56  ;;  %v378_v54 = vld [vmem:[#allocation2 + $0x778] sm:$0xff] }
 0x123   :  { %v493_v58 = vld [vmem:[#allocation2 + $0xb10] sm:$0xff]  ;;  %1089 = vmatpush.msrb.mxu0 %v429_v57  ;;  %v178_v55 = vld [vmem:[#allocation2 + $0x138] sm:$0xff] }
 0x124   :  { %v557_v59 = vld [vmem:[#allocation2 + $0xd10] sm:$0xff]  ;;  %1109 = vmatpush.msrb.mxu1 %v493_v58  ;;  %v242_v56 = vld [vmem:[#allocation2 + $0x338] sm:$0xff] }
 0x125   :  { %v625_v60 = vld [vmem:[#allocation2 + $0xf30] sm:$0xff]  ;;  %1129 = vmatpush.msrb.mxu2 %v557_v59  ;;  %v306_v57 = vld [vmem:[#allocation2 + $0x538] sm:$0xff] }
 0x126   :  { %v425_v61 = vld [vmem:[#allocation2 + $0x8f0] sm:$0xff]  ;;  %1148 = vmatpush.msrb.mxu3 %v625_v60  ;;  %v374_v58 = vld [vmem:[#allocation2 + $0x758] sm:$0xff] }
 0x127   :  { %v489_v62 = vld [vmem:[#allocation2 + $0xaf0] sm:$0xff]  ;;  %1090 = vmatpush.msrb.mxu0 %v425_v61  ;;  %v174_v59 = vld [vmem:[#allocation2 + $0x118] sm:$0xff] }
 0x128   :  { %v553_v63 = vld [vmem:[#allocation2 + $0xcf0] sm:$0xff]  ;;  %1110 = vmatpush.msrb.mxu1 %v489_v62  ;;  %v238_v60 = vld [vmem:[#allocation2 + $0x318] sm:$0xff] }
 0x129   :  { %v621_v0 = vld [vmem:[#allocation2 + $0xf10] sm:$0xff]  ;;  %1130 = vmatpush.msrb.mxu2 %v553_v63  ;;  %v302_v61 = vld [vmem:[#allocation2 + $0x518] sm:$0xff] }
 0x12a   :  { %v421_v4 = vld [vmem:[#allocation2 + $0x8d0] sm:$0xff]  ;;  %1149 = vmatpush.msrb.mxu3 %v621_v0  ;;  %v370_v62 = vld [vmem:[#allocation2 + $0x738] sm:$0xff] }
 0x12b   :  { %v485_v5 = vld [vmem:[#allocation2 + $0xad0] sm:$0xff]  ;;  %1091 = vmatpush.msrb.mxu0 %v421_v4  ;;  %v170_v63 = vld [vmem:[#allocation2 + $0xf8] sm:$0xff] }
 0x12c   :  { %v549_v6 = vld [vmem:[#allocation2 + $0xcd0] sm:$0xff]  ;;  %1111 = vmatpush.msrb.mxu1 %v485_v5  ;;  %v234_v0 = vld [vmem:[#allocation2 + $0x2f8] sm:$0xff] }
 0x12d   :  { %v617_v7 = vld [vmem:[#allocation2 + $0xef0] sm:$0xff]  ;;  %1131 = vmatpush.msrb.mxu2 %v549_v6  ;;  %v298_v4 = vld [vmem:[#allocation2 + $0x4f8] sm:$0xff] }
 0x12e   :  { %v417_v8 = vld [vmem:[#allocation2 + $0x8b0] sm:$0xff]  ;;  %1150 = vmatpush.msrb.mxu3 %v617_v7  ;;  %v366_v5 = vld [vmem:[#allocation2 + $0x718] sm:$0xff] }
 0x12f   :  { %v481_v10 = vld [vmem:[#allocation2 + $0xab0] sm:$0xff]  ;;  %1092 = vmatpush.msrb.mxu0 %v417_v8  ;;  %v166_v6 = vld [vmem:[#allocation2 + $0xd8] sm:$0xff] }
 0x130   :  { %v545_v11 = vld [vmem:[#allocation2 + $0xcb0] sm:$0xff]  ;;  %1112 = vmatpush.msrb.mxu1 %v481_v10  ;;  %v230_v7 = vld [vmem:[#allocation2 + $0x2d8] sm:$0xff] }
 0x131   :  { %v613_v12 = vld [vmem:[#allocation2 + $0xed0] sm:$0xff]  ;;  %1132 = vmatpush.msrb.mxu2 %v545_v11  ;;  %v294_v8 = vld [vmem:[#allocation2 + $0x4d8] sm:$0xff] }
 0x132   :  { %v413_v13 = vld [vmem:[#allocation2 + $0x890] sm:$0xff]  ;;  %1151 = vmatpush.msrb.mxu3 %v613_v12  ;;  %v362_v10 = vld [vmem:[#allocation2 + $0x6f8] sm:$0xff] }
 0x133   :  { %v477_v14 = vld [vmem:[#allocation2 + $0xa90] sm:$0xff]  ;;  %1093 = vmatpush.msrb.mxu0 %v413_v13  ;;  %v162_v11 = vld [vmem:[#allocation2 + $0xb8] sm:$0xff] }
 0x134   :  { %v541_v15 = vld [vmem:[#allocation2 + $0xc90] sm:$0xff]  ;;  %1113 = vmatpush.msrb.mxu1 %v477_v14  ;;  %v226_v12 = vld [vmem:[#allocation2 + $0x2b8] sm:$0xff] }
 0x135   :  { %v609_v16 = vld [vmem:[#allocation2 + $0xeb0] sm:$0xff]  ;;  %1133 = vmatpush.msrb.mxu2 %v541_v15  ;;  %v290_v13 = vld [vmem:[#allocation2 + $0x4b8] sm:$0xff] }
 0x136   :  { %v409_v17 = vld [vmem:[#allocation2 + $0x870] sm:$0xff]  ;;  %1152 = vmatpush.msrb.mxu3 %v609_v16  ;;  %v358_v14 = vld [vmem:[#allocation2 + $0x6d8] sm:$0xff] }
 0x137   :  { %v473_v18 = vld [vmem:[#allocation2 + $0xa70] sm:$0xff]  ;;  %1094 = vmatpush.msrb.mxu0 %v409_v17  ;;  %v158_v15 = vld [vmem:[#allocation2 + $0x98] sm:$0xff] }
 0x138   :  { %v537_v19 = vld [vmem:[#allocation2 + $0xc70] sm:$0xff]  ;;  %1114 = vmatpush.msrb.mxu1 %v473_v18  ;;  %v222_v16 = vld [vmem:[#allocation2 + $0x298] sm:$0xff] }
 0x139   :  { %v605_v20 = vld [vmem:[#allocation2 + $0xe90] sm:$0xff]  ;;  %1134 = vmatpush.msrb.mxu2 %v537_v19  ;;  %v286_v17 = vld [vmem:[#allocation2 + $0x498] sm:$0xff] }
 0x13a   :  { %v405_v22 = vld [vmem:[#allocation2 + $0x850] sm:$0xff]  ;;  %1153 = vmatpush.msrb.mxu3 %v605_v20  ;;  %v354_v18 = vld [vmem:[#allocation2 + $0x6b8] sm:$0xff] }
 0x13b   :  { %v469_v23 = vld [vmem:[#allocation2 + $0xa50] sm:$0xff]  ;;  %1095 = vmatpush.msrb.mxu0 %v405_v22  ;;  %v154_v19 = vld [vmem:[#allocation2 + $0x78] sm:$0xff] }
 0x13c   :  { %v533_v24 = vld [vmem:[#allocation2 + $0xc50] sm:$0xff]  ;;  %1115 = vmatpush.msrb.mxu1 %v469_v23  ;;  %v218_v20 = vld [vmem:[#allocation2 + $0x278] sm:$0xff] }
 0x13d   :  { %v601_v28 = vld [vmem:[#allocation2 + $0xe70] sm:$0xff]  ;;  %1135 = vmatpush.msrb.mxu2 %v533_v24  ;;  %v282_v22 = vld [vmem:[#allocation2 + $0x478] sm:$0xff] }
 0x13e   :  { %v401_v29 = vld [vmem:[#allocation2 + $0x830] sm:$0xff]  ;;  %1154 = vmatpush.msrb.mxu3 %v601_v28  ;;  %v350_v23 = vld [vmem:[#allocation2 + $0x698] sm:$0xff] }
 0x13f   :  { %v465_v30 = vld [vmem:[#allocation2 + $0xa30] sm:$0xff]  ;;  %1096 = vmatpush.msrb.mxu0 %v401_v29  ;;  %v150_v24 = vld [vmem:[#allocation2 + $0x58] sm:$0xff] }
 0x140   :  { %v529_v3 = vld [vmem:[#allocation2 + $0xc30] sm:$0xff]  ;;  %1116 = vmatpush.msrb.mxu1 %v465_v30  ;;  %v214_v28 = vld [vmem:[#allocation2 + $0x258] sm:$0xff] }
 0x141   :  { %v597_v31 = vld [vmem:[#allocation2 + $0xe50] sm:$0xff]  ;;  %1136 = vmatpush.msrb.mxu2 %v529_v3  ;;  %v278_v29 = vld [vmem:[#allocation2 + $0x458] sm:$0xff] }
 0x142   :  { %v397_v34 = vld [vmem:[#allocation2 + $0x810] sm:$0xff]  ;;  %1155 = vmatpush.msrb.mxu3 %v597_v31  ;;  %v346_v30 = vld [vmem:[#allocation2 + $0x678] sm:$0xff] }
 0x143   :  { %v461_v1 = vld [vmem:[#allocation2 + $0xa10] sm:$0xff]  ;;  %1097 = vmatpush.msrb.mxu0 %v397_v34  ;;  %v146_v3 = vld [vmem:[#allocation2 + $0x38] sm:$0xff] }
 0x144   :  { %v525_v35 = vld [vmem:[#allocation2 + $0xc10] sm:$0xff]  ;;  %1117 = vmatpush.msrb.mxu1 %v461_v1  ;;  %1098 = vmatmul.f32.vlgmr.msrb.gmra.mxu0 %v2159_v26  ;;  %v186_v26 = vld [vmem:[#allocation2 + $0x178] sm:$0xff] }
 0x145   :  { %v593_v2 = vld [vmem:[#allocation2 + $0xe30] sm:$0xff]  ;;  %1137 = vmatpush.msrb.mxu2 %v525_v35  ;;  %1162 = vmatpush.msra.mxu0 %v202_v9  ;;  %v210_v31 = vld [vmem:[#allocation2 + $0x238] sm:$0xff] }
 0x146   :  { %1156 = vmatpush.msrb.mxu3 %v593_v2  ;;  %v589_v38 = vld [vmem:[#allocation2 + $0xe10] sm:$0xff]  ;;  %1138 = vmatmul.f32.vlgmr.msrb.gmra.mxu2 %v2157_v21  ;;  %v190_v21 = vld [vmem:[#allocation2 + $0x198] sm:$0xff] }
 0x147   :  { %1182 = vmatpush.msra.mxu1 %v266_v36  ;;  %1202 = vmatpush.msra.mxu2 %v330_v37  ;;  %v274_v34 = vld [vmem:[#allocation2 + $0x438] sm:$0xff] }
 0x148   :  { %1157 = vmatpush.msrb.mxu3 %v589_v38  ;;  %1163 = vmatpush.msra.mxu0 %v198_v39  ;;  %v342_v1 = vld [vmem:[#allocation2 + $0x658] sm:$0xff] }
 0x149   :  { %1158 = vmatmul.f32.vlgmr.msrb.gmra.mxu3 %v2162_v27  ;;  %1183 = vmatpush.msra.mxu1 %v262_v40  ;;  %v250_v27 = vld [vmem:[#allocation2 + $0x378] sm:$0xff] }
 0x14a   :  { %1203 = vmatpush.msra.mxu2 %v326_v41  ;;  %1222 = vmatpush.msra.mxu3 %v394_v42  ;;  %v142_v35 = vld [vmem:[#allocation2 + $0x18] sm:$0xff] }
 0x14b   :  { %1118 = vmatmul.f32.vlgmr.msrb.gmra.mxu1 %v2165_v32  ;;  %1164 = vmatpush.msra.mxu0 %v194_v43  ;;  %v310_v32 = vld [vmem:[#allocation2 + $0x558] sm:$0xff] }
 0x14c   :  { %1184 = vmatpush.msra.mxu1 %v258_v44  ;;  %1204 = vmatpush.msra.mxu2 %v322_v45  ;;  %v206_v2 = vld [vmem:[#allocation2 + $0x218] sm:$0xff] }
 0x14d   :  { %1223 = vmatpush.msra.mxu3 %v390_v46  ;;  %1165 = vmatpush.msra.mxu0 %v190_v21  ;;  %v270_v9 = vld [vmem:[#allocation2 + $0x418] sm:$0xff] }
 0x14e   :  { %1185 = vmatpush.msra.mxu1 %v254_v47  ;;  %1205 = vmatpush.msra.mxu2 %v318_v48  ;;  %v338_v36 = vld [vmem:[#allocation2 + $0x638] sm:$0xff] }
 0x14f   :  { %1224 = vmatpush.msra.mxu3 %v386_v49  ;;  %1166 = vmatpush.msra.mxu0 %v186_v26  ;;  %v458_v37 = vld [vmem:[#allocation2 + $0x9f8] sm:$0xff] }
 0x150   :  { %1186 = vmatpush.msra.mxu1 %v250_v27  ;;  %1206 = vmatpush.msra.mxu2 %v314_v50  ;;  %v522_v38 = vld [vmem:[#allocation2 + $0xbf8] sm:$0xff] }
 0x151   :  { %1225 = vmatpush.msra.mxu3 %v382_v51  ;;  %1167 = vmatpush.msra.mxu0 %v182_v52  ;;  %v586_v39 = vld [vmem:[#allocation2 + $0xdf8] sm:$0xff] }
 0x152   :  { %1187 = vmatpush.msra.mxu1 %v246_v53  ;;  %1207 = vmatpush.msra.mxu2 %v310_v32  ;;  %v334_v40 = vld [vmem:[#allocation2 + $0x618] sm:$0xff] }
 0x153   :  { %1226 = vmatpush.msra.mxu3 %v378_v54  ;;  %1168 = vmatpush.msra.mxu0 %v178_v55  ;;  %v454_v41 = vld [vmem:[#allocation2 + $0x9d8] sm:$0xff] }
 0x154   :  { %1188 = vmatpush.msra.mxu1 %v242_v56  ;;  %1208 = vmatpush.msra.mxu2 %v306_v57  ;;  %v518_v42 = vld [vmem:[#allocation2 + $0xbd8] sm:$0xff] }
 0x155   :  { %1227 = vmatpush.msra.mxu3 %v374_v58  ;;  %1169 = vmatpush.msra.mxu0 %v174_v59  ;;  %v582_v43 = vld [vmem:[#allocation2 + $0xdd8] sm:$0xff] }
 0x156   :  { %1189 = vmatpush.msra.mxu1 %v238_v60  ;;  %1209 = vmatpush.msra.mxu2 %v302_v61  ;;  %v650_v44 = vld [vmem:[#allocation2 + $0xff8] sm:$0xff]  ;;  %v2189_v61 = vpop.f32.mrf.mxu0 }
 0x157   :  { %1228 = vmatpush.msra.mxu3 %v370_v62  ;;  %1170 = vmatpush.msra.mxu0 %v170_v63  ;;  %v450_v45 = vld [vmem:[#allocation2 + $0x9b8] sm:$0xff] }
 0x158   :  { %1190 = vmatpush.msra.mxu1 %v234_v0  ;;  %1210 = vmatpush.msra.mxu2 %v298_v4  ;;  %v514_v46 = vld [vmem:[#allocation2 + $0xbb8] sm:$0xff] }
 0x159   :  { %1229 = vmatpush.msra.mxu3 %v366_v5  ;;  %1171 = vmatpush.msra.mxu0 %v166_v6  ;;  %v578_v21 = vld [vmem:[#allocation2 + $0xdb8] sm:$0xff] }
 0x15a   :  { %1191 = vmatpush.msra.mxu1 %v230_v7  ;;  %1211 = vmatpush.msra.mxu2 %v294_v8  ;;  %v646_v47 = vld [vmem:[#allocation2 + $0xfd8] sm:$0xff] }
 0x15b   :  { %1230 = vmatpush.msra.mxu3 %v362_v10  ;;  %1172 = vmatpush.msra.mxu0 %v162_v11  ;;  %v446_v48 = vld [vmem:[#allocation2 + $0x998] sm:$0xff]  ;;  %v2191_v10 = vpop.f32.mrf.mxu1 }
 0x15c   :  { %1192 = vmatpush.msra.mxu1 %v226_v12  ;;  %1212 = vmatpush.msra.mxu2 %v290_v13  ;;  %v510_v49 = vld [vmem:[#allocation2 + $0xb98] sm:$0xff] }
 0x15d   :  { %1231 = vmatpush.msra.mxu3 %v358_v14  ;;  %1173 = vmatpush.msra.mxu0 %v158_v15  ;;  %v574_v26 = vld [vmem:[#allocation2 + $0xd98] sm:$0xff] }
 0x15e   :  { %1193 = vmatpush.msra.mxu1 %v222_v16  ;;  %1213 = vmatpush.msra.mxu2 %v286_v17  ;;  %v642_v27 = vld [vmem:[#allocation2 + $0xfb8] sm:$0xff] }
 0x15f   :  { %1232 = vmatpush.msra.mxu3 %v354_v18  ;;  %1174 = vmatpush.msra.mxu0 %v154_v19  ;;  %v442_v50 = vld [vmem:[#allocation2 + $0x978] sm:$0xff]  ;;  %v2193_v19 = vpop.f32.mrf.mxu2 }
 0x160   :  { %1194 = vmatpush.msra.mxu1 %v218_v20  ;;  %1214 = vmatpush.msra.mxu2 %v282_v22  ;;  %v506_v51 = vld [vmem:[#allocation2 + $0xb78] sm:$0xff] }
 0x161   :  { %1233 = vmatpush.msra.mxu3 %v350_v23  ;;  %1175 = vmatpush.msra.mxu0 %v150_v24  ;;  %v570_v52 = vld [vmem:[#allocation2 + $0xd78] sm:$0xff] }
 0x162   :  { %1195 = vmatpush.msra.mxu1 %v214_v28  ;;  %1215 = vmatpush.msra.mxu2 %v278_v29  ;;  %v638_v53 = vld [vmem:[#allocation2 + $0xf98] sm:$0xff]  ;;  %v2195_v28 = vpop.f32.mrf.mxu0 }
 0x163   :  { %1234 = vmatpush.msra.mxu3 %v346_v30  ;;  %1176 = vmatpush.msra.mxu0 %v146_v3  ;;  %v438_v32 = vld [vmem:[#allocation2 + $0x958] sm:$0xff] }
 0x164   :  { %1196 = vmatpush.msra.mxu1 %v210_v31  ;;  %1216 = vmatpush.msra.mxu2 %v274_v34  ;;  %v502_v54 = vld [vmem:[#allocation2 + $0xb58] sm:$0xff]  ;;  %v2197_v31 = vpop.f32.mrf.mxu3 }
 0x165   :  { %1235 = vmatpush.msra.mxu3 %v342_v1  ;;  %1177 = vmatpush.msra.mxu0 %v142_v35  ;;  %v566_v55 = vld [vmem:[#allocation2 + $0xd58] sm:$0xff]  ;;  %v1814_v1 = vld.sshfl [vmem:[#allocation1 + $0x10] sm:$0xff pattern:$0x73625140] }
 0x166   :  { %1197 = vmatpush.msra.mxu1 %v206_v2  ;;  %1217 = vmatpush.msra.mxu2 %v270_v9  ;;  %v634_v56 = vld [vmem:[#allocation2 + $0xf78] sm:$0xff]  ;;  %v2199_v2 = vld [vmem:[#allocation5] sm:$0xf]  ;;  %v2201_v9 = vpop.f32.mrf.mxu1 }
 0x167   :  { %1236 = vmatpush.msra.mxu3 %v338_v36  ;;  %1242 = vmatpush.msrb.mxu0 %v458_v37  ;;  %v434_v57 = vld [vmem:[#allocation2 + $0x938] sm:$0xff] }
 0x168   :  { %1262 = vmatpush.msrb.mxu1 %v522_v38  ;;  %1282 = vmatpush.msrb.mxu2 %v586_v39  ;;  %v498_v58 = vld [vmem:[#allocation2 + $0xb38] sm:$0xff]  ;;  %v1815_v39 = vld.sshfl [vmem:[#allocation1 + $0x18] sm:$0xff pattern:$0x73625140] }
 0x169   :  { %1237 = vmatpush.msra.mxu3 %v334_v40  ;;  %1243 = vmatpush.msrb.mxu0 %v454_v41  ;;  %v562_v59 = vld [vmem:[#allocation2 + $0xd38] sm:$0xff] }
 0x16a   :  { %1263 = vmatpush.msrb.mxu1 %v518_v42  ;;  %1283 = vmatpush.msrb.mxu2 %v582_v43  ;;  %v630_v60 = vld [vmem:[#allocation2 + $0xf58] sm:$0xff]  ;;  %v653_v42 = vperm.slane %v2199_v2, 0 }
 0x16b   :  { %1302 = vmatpush.msrb.mxu3 %v650_v44  ;;  %1244 = vmatpush.msrb.mxu0 %v450_v45  ;;  %v430_v62 = vld [vmem:[#allocation2 + $0x918] sm:$0xff]  ;;  %v654_v45 = vperm.slane %v2199_v2, 1 }
 0x16c   :  { %1264 = vmatpush.msrb.mxu1 %v514_v46  ;;  %1284 = vmatpush.msrb.mxu2 %v578_v21  ;;  %v494_v63 = vld [vmem:[#allocation2 + $0xb18] sm:$0xff]  ;;  %v2206_v46 = vpop.f32.mrf.mxu2 }
 0x16d   :  { %1303 = vmatpush.msrb.mxu3 %v646_v47  ;;  %1245 = vmatpush.msrb.mxu0 %v446_v48  ;;  %v558_v0 = vld [vmem:[#allocation2 + $0xd18] sm:$0xff]  ;;  %v859_v47 = vpop.f32.mrf.mxu0 }
 0x16e   :  { %1265 = vmatpush.msrb.mxu1 %v510_v49  ;;  %1285 = vmatpush.msrb.mxu2 %v574_v26  ;;  %v626_v4 = vld [vmem:[#allocation2 + $0xf38] sm:$0xff] }
 0x16f   :  { %1304 = vmatpush.msrb.mxu3 %v642_v27  ;;  %1246 = vmatpush.msrb.mxu0 %v442_v50  ;;  %v426_v5 = vld [vmem:[#allocation2 + $0x8f8] sm:$0xff]  ;;  %v700_v27 = vadd.f32 %v2189_v61, %v653_v42 }
 0x170   :  { %1266 = vmatpush.msrb.mxu1 %v506_v51  ;;  %1286 = vmatpush.msrb.mxu2 %v570_v52  ;;  %v490_v6 = vld [vmem:[#allocation2 + $0xaf8] sm:$0xff]  ;;  %v860_v52 = vadd.f32 %v859_v47, %v654_v45  ;;  %v1402_v45 = vld [vmem:[#allocation7 + $0x260] sm:$0xff] }
 0x171   :  { %1305 = vmatpush.msrb.mxu3 %v638_v53  ;;  %1247 = vmatpush.msrb.mxu0 %v438_v32  ;;  %v554_v7 = vld [vmem:[#allocation2 + $0xcf8] sm:$0xff]  ;;  %v2210_v53 = vpop.f32.mrf.mxu3  ;;  %v1816_v32 = vld.sshfl [vmem:[#allocation1 + $0x30] sm:$0xff pattern:$0x73625140] }
 0x172   :  { %1267 = vmatpush.msrb.mxu1 %v502_v54  ;;  %1287 = vmatpush.msrb.mxu2 %v566_v55  ;;  %v622_v8 = vld [vmem:[#allocation2 + $0xf18] sm:$0xff]  ;;  %v1354_v54 = vld [vmem:[#allocation7 + $0xe0] sm:$0xff] }
 0x173   :  { %1306 = vmatpush.msrb.mxu3 %v634_v56  ;;  %1248 = vmatpush.msrb.mxu0 %v434_v57  ;;  %v422_v11 = vld [vmem:[#allocation2 + $0x8d8] sm:$0xff]  ;;  %v1386_v55 = vld [vmem:[#allocation7 + $0x1e0] sm:$0xff]  ;;  %v720_v57 = vadd.f32 %v2191_v10, %v700_v27 }
 0x174   :  { %1268 = vmatpush.msrb.mxu1 %v498_v58  ;;  %1288 = vmatpush.msrb.mxu2 %v562_v59  ;;  %v486_v12 = vld [vmem:[#allocation2 + $0xad8] sm:$0xff]  ;;  %v1818_v59 = vld.sshfl [vmem:[#allocation1 + $0x38] sm:$0xff pattern:$0x73625140] }
 0x175   :  { %1307 = vmatpush.msrb.mxu3 %v630_v60  ;;  %1249 = vmatpush.msrb.mxu0 %v430_v62  ;;  %v550_v13 = vld [vmem:[#allocation2 + $0xcd8] sm:$0xff] }
 0x176   :  { %1269 = vmatpush.msrb.mxu1 %v494_v63  ;;  %1289 = vmatpush.msrb.mxu2 %v558_v0  ;;  %v618_v14 = vld [vmem:[#allocation2 + $0xef8] sm:$0xff]  ;;  %v899_v63 = vpop.f32.mrf.mxu2  ;;  %v1418_v0 = vld [vmem:[#allocation7 + $0x2e0] sm:$0xff] }
 0x177   :  { %1308 = vmatpush.msrb.mxu3 %v626_v4  ;;  %1250 = vmatpush.msrb.mxu0 %v426_v5  ;;  %v418_v15 = vld [vmem:[#allocation2 + $0x8b8] sm:$0xff]  ;;  %v1819_v4 = vld.sshfl [vmem:[#allocation1 + $0x28] sm:$0xff pattern:$0x73625140] }
 0x178   :  { %1270 = vmatpush.msrb.mxu1 %v490_v6  ;;  %1290 = vmatpush.msrb.mxu2 %v554_v7  ;;  %v482_v16 = vld [vmem:[#allocation2 + $0xab8] sm:$0xff]  ;;  %v1350_v5 = vld [vmem:[#allocation7 + $0xc0] sm:$0xff] }
 0x179   :  { %1309 = vmatpush.msrb.mxu3 %v622_v8  ;;  %1251 = vmatpush.msrb.mxu0 %v422_v11  ;;  %v546_v17 = vld [vmem:[#allocation2 + $0xcb8] sm:$0xff]  ;;  %v1382_v6 = vld [vmem:[#allocation7 + $0x1c0] sm:$0xff]  ;;  %v740_v8 = vadd.f32 %v2193_v19, %v720_v57  ;;  %v939_v19 = vpop.f32.mrf.mxu0 }
 0x17a   :  { %1271 = vmatpush.msrb.mxu1 %v486_v12  ;;  %v614_v18 = vld [vmem:[#allocation2 + $0xed8] sm:$0xff]  ;;  %1291 = vmatpush.msrb.mxu2 %v550_v13  ;;  %v919_v13 = vpop.f32.mrf.mxu3  ;;  %v1326_v57 = vld [vmem:[#allocation7] sm:$0xff] }
 0x17b   :  { %1310 = vmatpush.msrb.mxu3 %v618_v14  ;;  %v414_v20 = vld [vmem:[#allocation2 + $0x898] sm:$0xff]  ;;  %1252 = vmatpush.msrb.mxu0 %v418_v15  ;;  %v1414_v14 = vld [vmem:[#allocation7 + $0x2c0] sm:$0xff] }
 0x17c   :  { %v478_v22 = vld [vmem:[#allocation2 + $0xa98] sm:$0xff]  ;;  %1272 = vmatpush.msrb.mxu1 %v482_v16  ;;  %1292 = vmatpush.msrb.mxu2 %v546_v17  ;;  %v1346_v15 = vld [vmem:[#allocation7 + $0xa0] sm:$0xff] }
 0x17d   :  { %v542_v23 = vld [vmem:[#allocation2 + $0xc98] sm:$0xff]  ;;  %1311 = vmatpush.msrb.mxu3 %v614_v18  ;;  %1253 = vmatpush.msrb.mxu0 %v414_v20  ;;  %v1378_v16 = vld [vmem:[#allocation7 + $0x1a0] sm:$0xff]  ;;  %v760_v18 = vadd.f32 %v2197_v31, %v740_v8  ;;  %v1351_v8 = vld [vmem:[#allocation7 + $0xc8] sm:$0xff] }
 0x17e   :  { %v610_v24 = vld [vmem:[#allocation2 + $0xeb8] sm:$0xff]  ;;  %1273 = vmatpush.msrb.mxu1 %v478_v22  ;;  %1293 = vmatpush.msrb.mxu2 %v542_v23 }
 0x17f   :  { %v410_v29 = vld [vmem:[#allocation2 + $0x878] sm:$0xff]  ;;  %1312 = vmatpush.msrb.mxu3 %v610_v24  ;;  %1218 = vmatmul.f32.vlgmr.msra.gmra.mxu2 %v1814_v1  ;;  %v1410_v24 = vld [vmem:[#allocation7 + $0x2a0] sm:$0xff] }
 0x180   :  { %v474_v30 = vld [vmem:[#allocation2 + $0xa78] sm:$0xff]  ;;  %1254 = vmatpush.msrb.mxu0 %v410_v29  ;;  %1238 = vmatmul.f32.vlgmr.msra.gmra.mxu3 %v1815_v39  ;;  %v1342_v29 = vld [vmem:[#allocation7 + $0x80] sm:$0xff] }
 0x181   :  { %v538_v3 = vld [vmem:[#allocation2 + $0xc78] sm:$0xff]  ;;  %1274 = vmatpush.msrb.mxu1 %v474_v30  ;;  %1178 = vmatmul.f32.vlgmr.msra.gmra.mxu0 %v2178_v25  ;;  %v1374_v30 = vld [vmem:[#allocation7 + $0x180] sm:$0xff] }
 0x182   :  { %v606_v34 = vld [vmem:[#allocation2 + $0xe98] sm:$0xff]  ;;  %1294 = vmatpush.msrb.mxu2 %v538_v3  ;;  %1198 = vmatmul.f32.vlgmr.msra.gmra.mxu1 %v2182_v33  ;;  %v879_v33 = vpop.f32.mrf.mxu1  ;;  %v1370_v39 = vld [vmem:[#allocation7 + $0x160] sm:$0xff] }
 0x183   :  { %v406_v35 = vld [vmem:[#allocation2 + $0x858] sm:$0xff]  ;;  %1313 = vmatpush.msrb.mxu3 %v606_v34  ;;  %v880_v62 = vadd.f32 %v879_v33, %v860_v52  ;;  %v780_v34 = vadd.f32 %v2195_v28, %v760_v18  ;;  %v979_v28 = vpop.f32.mrf.mxu2  ;;  %v1362_v52 = vld [vmem:[#allocation7 + $0x120] sm:$0xff]  ;;  %v1415_v18 = vld [vmem:[#allocation7 + $0x2c8] sm:$0xff] }
 0x184   :  { %v470_v36 = vld [vmem:[#allocation2 + $0xa58] sm:$0xff]  ;;  %1255 = vmatpush.msrb.mxu0 %v406_v35 }
 0x185   :  { %v534_v37 = vld [vmem:[#allocation2 + $0xc58] sm:$0xff]  ;;  %1275 = vmatpush.msrb.mxu1 %v470_v36  ;;  %v900_v10 = vadd.f32 %v899_v63, %v880_v62  ;;  %v1355_v63 = vld [vmem:[#allocation7 + $0xe8] sm:$0xff] }
 0x186   :  { %v602_v38 = vld [vmem:[#allocation2 + $0xe78] sm:$0xff]  ;;  %1295 = vmatpush.msrb.mxu2 %v534_v37  ;;  %v1406_v37 = vld [vmem:[#allocation7 + $0x280] sm:$0xff] }
 0x187   :  { %v402_v40 = vld [vmem:[#allocation2 + $0x838] sm:$0xff]  ;;  %1314 = vmatpush.msrb.mxu3 %v602_v38  ;;  %v920_v20 = vadd.f32 %v919_v13, %v900_v10  ;;  %v1338_v38 = vld [vmem:[#allocation7 + $0x60] sm:$0xff]  ;;  %v1383_v10 = vld [vmem:[#allocation7 + $0x1c8] sm:$0xff] }
 0x188   :  { %v466_v41 = vld [vmem:[#allocation2 + $0xa38] sm:$0xff]  ;;  %1256 = vmatpush.msrb.mxu0 %v402_v40 }
 0x189   :  { %v530_v43 = vld [vmem:[#allocation2 + $0xc38] sm:$0xff]  ;;  %1276 = vmatpush.msrb.mxu1 %v466_v41  ;;  %v940_v1 = vadd.f32 %v939_v19, %v920_v20  ;;  %v800_v41 = vadd.f32 %v2201_v9, %v780_v34  ;;  %v999_v9 = vpop.f32.mrf.mxu3  ;;  %v1343_v19 = vld [vmem:[#allocation7 + $0x88] sm:$0xff]  ;;  %v655_v34 = vperm.slane %v2199_v2, 2 }
 0x18a   :  { %v598_v44 = vld [vmem:[#allocation2 + $0xe58] sm:$0xff]  ;;  %1296 = vmatpush.msrb.mxu2 %v530_v43  ;;  %v959_v31 = vpop.f32.mrf.mxu1 }
 0x18b   :  { %v398_v25 = vld [vmem:[#allocation2 + $0x818] sm:$0xff]  ;;  %1315 = vmatpush.msrb.mxu3 %v598_v44  ;;  %v960_v42 = vadd.f32 %v959_v31, %v940_v1  ;;  %v1339_v31 = vld [vmem:[#allocation7 + $0x68] sm:$0xff] }
 0x18c   :  { %v462_v21 = vld [vmem:[#allocation2 + $0xa18] sm:$0xff]  ;;  %1257 = vmatpush.msrb.mxu0 %v398_v25  ;;  %v1334_v25 = vld [vmem:[#allocation7 + $0x40] sm:$0xff] }
 0x18d   :  { %v526_v48 = vld [vmem:[#allocation2 + $0xc18] sm:$0xff]  ;;  %1277 = vmatpush.msrb.mxu1 %v462_v21  ;;  %v1366_v21 = vld [vmem:[#allocation7 + $0x140] sm:$0xff] }
 0x18e   :  { %v594_v49 = vld [vmem:[#allocation2 + $0xe38] sm:$0xff]  ;;  %1297 = vmatpush.msrb.mxu2 %v526_v48  ;;  %1278 = vmatmul.f32.vlgmr.msrb.gmra.mxu1 %v1819_v4  ;;  %v820_v48 = vadd.f32 %v2206_v46, %v800_v41  ;;  %v1390_v4 = vld [vmem:[#allocation7 + $0x200] sm:$0xff] }
 0x18f   :  { %v1356_v26 = vld [vmem:[#allocation7 + $0xf0] sm:$0xff]  ;;  %1316 = vmatpush.msrb.mxu3 %v594_v49  ;;  %1298 = vmatmul.f32.vlgmr.msrb.gmra.mxu2 %v1816_v32  ;;  %v980_v49 = vadd.f32 %v979_v28, %v960_v42  ;;  %v1381_v13 = vld [vmem:[#allocation7 + $0x1b8] sm:$0xff] }
 0x190   :  { %v1388_v50 = vld [vmem:[#allocation7 + $0x1f0] sm:$0xff]  ;;  %1460 = vmatpush.msra.mxu0 %v1356_v26  ;;  %v2219_v32 = vadd.f32 %v2210_v53, %v820_v48  ;;  %v1389_v53 = vld [vmem:[#allocation7 + $0x1f8] sm:$0xff] }
 0x191   :  { %v590_v51 = vld [vmem:[#allocation2 + $0xe18] sm:$0xff]  ;;  %1480 = vmatpush.msra.mxu1 %v1388_v50  ;;  %v1398_v50 = vld [vmem:[#allocation7 + $0x240] sm:$0xff] }
 0x192   :  { %1317 = vmatpush.msrb.mxu3 %v590_v51  ;;  %v1420_v56 = vld [vmem:[#allocation7 + $0x2f0] sm:$0xff]  ;;  %1461 = vmatpush.msra.mxu0 %v1354_v54  ;;  %v1330_v51 = vld [vmem:[#allocation7 + $0x20] sm:$0xff]  ;;  %v2221_v54 = vadd.f32 %v999_v9, %v980_v49  ;;  %v1345_v20 = vld [vmem:[#allocation7 + $0x98] sm:$0xff] }
 0x193   :  { %v1817_v58 = vld.sshfl [vmem:[#allocation1 + $0x20] sm:$0xff pattern:$0x73625140]  ;;  %1318 = vmatmul.f32.vlgmr.msrb.gmra.mxu3 %v1818_v59  ;;  %1481 = vmatpush.msra.mxu1 %v1386_v55  ;;  %v1322_v59 = vmax.f32 %v2219_v32, 0.0  ;;  %v1403_v49 = vld [vmem:[#allocation7 + $0x268] sm:$0xff]  ;;  %v1426_v32 = vld [vmem:[#allocation7 + $0x320] sm:$0xff] }
 0x194   :  { %1258 = vmatmul.f32.vlgmr.msrb.gmra.mxu0 %v1817_v58  ;;  %v1352_v60 = vld [vmem:[#allocation7 + $0xd0] sm:$0xff]  ;;  %1500 = vmatpush.msra.mxu2 %v1420_v56  ;;  %v1394_v56 = vld [vmem:[#allocation7 + $0x220] sm:$0xff]  ;;  %v1409_v1 = vld [vmem:[#allocation7 + $0x298] sm:$0xff] }
 0x195   :  { %v1384_v61 = vld [vmem:[#allocation7 + $0x1d0] sm:$0xff]  ;;  %1462 = vmatpush.msra.mxu0 %v1352_v60  ;;  %v1358_v58 = vld [vmem:[#allocation7 + $0x100] sm:$0xff]  ;;  %v1323_v60 = vmax.f32 %v2221_v54, 0.0  ;;  %v1337_v41 = vld [vmem:[#allocation7 + $0x58] sm:$0xff]  ;;  %v1059_v48 = vpop.f32.mrf.mxu2 }
 0x196   :  { %1482 = vmatpush.msra.mxu1 %v1384_v61  ;;  %v1416_v7 = vld [vmem:[#allocation7 + $0x2d0] sm:$0xff]  ;;  %1501 = vmatpush.msra.mxu2 %v1418_v0  ;;  %v1357_v61 = vld [vmem:[#allocation7 + $0xf8] sm:$0xff]  ;;  %v1387_v0 = vld [vmem:[#allocation7 + $0x1e8] sm:$0xff] }
 0x197   :  { %v1348_v11 = vld [vmem:[#allocation7 + $0xb0] sm:$0xff]  ;;  %1463 = vmatpush.msra.mxu0 %v1350_v5  ;;  %v1353_v5 = vld [vmem:[#allocation7 + $0xd8] sm:$0xff] }
 0x198   :  { %v1380_v12 = vld [vmem:[#allocation7 + $0x1b0] sm:$0xff]  ;;  %1483 = vmatpush.msra.mxu1 %v1382_v6  ;;  %1502 = vmatpush.msra.mxu2 %v1416_v7  ;;  %v1385_v6 = vld [vmem:[#allocation7 + $0x1d8] sm:$0xff] }
 0x199   :  { %1464 = vmatpush.msra.mxu0 %v1348_v11  ;;  %v1412_v17 = vld [vmem:[#allocation7 + $0x2b0] sm:$0xff]  ;;  %v1421_v7 = vld [vmem:[#allocation7 + $0x2f8] sm:$0xff]  ;;  %v1419_v11 = vld [vmem:[#allocation7 + $0x2e8] sm:$0xff] }
 0x19a   :  { %1484 = vmatpush.msra.mxu1 %v1380_v12  ;;  %v1344_v22 = vld [vmem:[#allocation7 + $0x90] sm:$0xff]  ;;  %1503 = vmatpush.msra.mxu2 %v1414_v14  ;;  %v1349_v12 = vld [vmem:[#allocation7 + $0xb8] sm:$0xff] }
 0x19b   :  { %v1376_v23 = vld [vmem:[#allocation7 + $0x190] sm:$0xff]  ;;  %1465 = vmatpush.msra.mxu0 %v1346_v15  ;;  %v1417_v14 = vld [vmem:[#allocation7 + $0x2d8] sm:$0xff]  ;;  %v1347_v15 = vld [vmem:[#allocation7 + $0xa8] sm:$0xff] }
 0x19c   :  { %1485 = vmatpush.msra.mxu1 %v1378_v16  ;;  %1504 = vmatpush.msra.mxu2 %v1412_v17  ;;  %v1408_v3 = vld [vmem:[#allocation7 + $0x290] sm:$0xff]  ;;  %v1379_v16 = vld [vmem:[#allocation7 + $0x1a8] sm:$0xff]  ;;  %v1369_v42 = vld [vmem:[#allocation7 + $0x158] sm:$0xff] }
 0x19d   :  { %1466 = vmatpush.msra.mxu0 %v1344_v22  ;;  %v1340_v35 = vld [vmem:[#allocation7 + $0x70] sm:$0xff]  ;;  %v1377_v22 = vld [vmem:[#allocation7 + $0x198] sm:$0xff] }
 0x19e   :  { %1486 = vmatpush.msra.mxu1 %v1376_v23  ;;  %v1372_v36 = vld [vmem:[#allocation7 + $0x170] sm:$0xff]  ;;  %1505 = vmatpush.msra.mxu2 %v1410_v24  ;;  %v1413_v23 = vld [vmem:[#allocation7 + $0x2b8] sm:$0xff]  ;;  %v1375_v24 = vld [vmem:[#allocation7 + $0x188] sm:$0xff] }
 0x19f   :  { %1467 = vmatpush.msra.mxu0 %v1342_v29  ;;  %v1404_v40 = vld [vmem:[#allocation7 + $0x270] sm:$0xff]  ;;  %v1411_v29 = vld [vmem:[#allocation7 + $0x2a8] sm:$0xff]  ;;  %v1365_v9 = vld [vmem:[#allocation7 + $0x138] sm:$0xff] }
 0x1a0   :  { %1487 = vmatpush.msra.mxu1 %v1374_v30  ;;  %1506 = vmatpush.msra.mxu2 %v1408_v3  ;;  %v1336_v43 = vld [vmem:[#allocation7 + $0x50] sm:$0xff]  ;;  %v1341_v30 = vld [vmem:[#allocation7 + $0x78] sm:$0xff] }
 0x1a1   :  { %1468 = vmatpush.msra.mxu0 %v1340_v35  ;;  %v1368_v44 = vld [vmem:[#allocation7 + $0x150] sm:$0xff]  ;;  %v1373_v3 = vld [vmem:[#allocation7 + $0x178] sm:$0xff]  ;;  %v1450_v35 = vld [vmem:[#allocation7 + $0x3e0] sm:$0xff] }
 0x1a2   :  { %1488 = vmatpush.msra.mxu1 %v1372_v36  ;;  %1507 = vmatpush.msra.mxu2 %v1406_v37  ;;  %v1400_v47 = vld [vmem:[#allocation7 + $0x250] sm:$0xff]  ;;  %v1371_v37 = vld [vmem:[#allocation7 + $0x168] sm:$0xff] }
 0x1a3   :  { %1469 = vmatpush.msra.mxu0 %v1338_v38  ;;  %v1332_v26 = vld [vmem:[#allocation7 + $0x30] sm:$0xff]  ;;  %v1019_v38 = vpop.f32.mrf.mxu0 }
 0x1a4   :  { %1489 = vmatpush.msra.mxu1 %v1370_v39  ;;  %1508 = vmatpush.msra.mxu2 %v1404_v40  ;;  %v1364_v27 = vld [vmem:[#allocation7 + $0x130] sm:$0xff]  ;;  %v1407_v39 = vld [vmem:[#allocation7 + $0x288] sm:$0xff]  ;;  %v1446_v40 = vld [vmem:[#allocation7 + $0x3c0] sm:$0xff] }
 0x1a5   :  { %1470 = vmatpush.msra.mxu0 %v1336_v43  ;;  %v1396_v33 = vld [vmem:[#allocation7 + $0x230] sm:$0xff]  ;;  %v1020_v43 = vadd.f32 %v1019_v38, %v655_v34  ;;  %v1441_v34 = vld [vmem:[#allocation7 + $0x398] sm:$0xff] }
 0x1a6   :  { %1490 = vmatpush.msra.mxu1 %v1368_v44  ;;  %1509 = vmatpush.msra.mxu2 %v1402_v45  ;;  %v1328_v46 = vld [vmem:[#allocation7 + $0x10] sm:$0xff]  ;;  %v1405_v44 = vld [vmem:[#allocation7 + $0x278] sm:$0xff]  ;;  %v1335_v45 = vld [vmem:[#allocation7 + $0x48] sm:$0xff] }
 0x1a7   :  { %1471 = vmatpush.msra.mxu0 %v1334_v25  ;;  %v1360_v55 = vld [vmem:[#allocation7 + $0x110] sm:$0xff]  ;;  %v1367_v25 = vld [vmem:[#allocation7 + $0x148] sm:$0xff]  ;;  %v1429_v38 = vld [vmem:[#allocation7 + $0x338] sm:$0xff] }
 0x1a8   :  { %1491 = vmatpush.msra.mxu1 %v1366_v21  ;;  %1510 = vmatpush.msra.mxu2 %v1400_v47  ;;  %v1392_v62 = vld [vmem:[#allocation7 + $0x210] sm:$0xff]  ;;  %v1039_v21 = vpop.f32.mrf.mxu1 }
 0x1a9   :  { %1472 = vmatpush.msra.mxu0 %v1332_v26  ;;  %v1452_v17 = vld [vmem:[#allocation7 + $0x3f0] sm:$0xff]  ;;  %v1040_v47 = vadd.f32 %v1039_v21, %v1020_v43  ;;  %v1442_v26 = vld [vmem:[#allocation7 + $0x3a0] sm:$0xff] }
 0x1aa   :  { %1492 = vmatpush.msra.mxu1 %v1364_v27  ;;  %1511 = vmatpush.msra.mxu2 %v1398_v50  ;;  %v1448_v36 = vld [vmem:[#allocation7 + $0x3d0] sm:$0xff]  ;;  %v1333_v27 = vld [vmem:[#allocation7 + $0x38] sm:$0xff] }
 0x1ab   :  { %1473 = vmatpush.msra.mxu0 %v1330_v51  ;;  %1520 = vmatpush.msra.mxu3 %v1452_v17  ;;  %v1444_v28 = vld [vmem:[#allocation7 + $0x3b0] sm:$0xff]  ;;  %v1060_v50 = vadd.f32 %v1059_v48, %v1040_v47  ;;  %v1401_v51 = vld [vmem:[#allocation7 + $0x258] sm:$0xff]  ;;  %v1391_v17 = vld [vmem:[#allocation7 + $0x208] sm:$0xff] }
 0x1ac   :  { %1493 = vmatpush.msra.mxu1 %v1362_v52  ;;  %1512 = vmatpush.msra.mxu2 %v1396_v33  ;;  %v1440_v52 = vld [vmem:[#allocation7 + $0x390] sm:$0xff]  ;;  %v1331_v33 = vld [vmem:[#allocation7 + $0x28] sm:$0xff] }
 0x1ad   :  { %1474 = vmatpush.msra.mxu0 %v1328_v46  ;;  %1521 = vmatpush.msra.mxu3 %v1450_v35  ;;  %v1363_v46 = vld [vmem:[#allocation7 + $0x128] sm:$0xff]  ;;  %v1424_v54 = vld [vmem:[#allocation7 + $0x310] sm:$0xff]  ;;  %v1437_v35 = vld [vmem:[#allocation7 + $0x378] sm:$0xff] }
 0x1ae   :  { %1494 = vmatpush.msra.mxu1 %v1360_v55  ;;  %1513 = vmatpush.msra.mxu2 %v1394_v56  ;;  %v1079_v55 = vpop.f32.mrf.mxu3 }
 0x1af   :  { %1475 = vmatpush.msra.mxu0 %v1326_v57  ;;  %1522 = vmatpush.msra.mxu3 %v1448_v36  ;;  %v1080_v56 = vadd.f32 %v1079_v55, %v1060_v50  ;;  %v1399_v57 = vld [vmem:[#allocation7 + $0x248] sm:$0xff]  ;;  %v1636_v55 = vld [vmem:[#allocation10 + $0x70] sm:$0xff] }
 0x1b0   :  { %1495 = vmatpush.msra.mxu1 %v1358_v58  ;;  %1476 = vmatmul.f32.vlgmr.msra.gmra.mxu0 %v1322_v59  ;;  %v1438_v58 = vld [vmem:[#allocation7 + $0x380] sm:$0xff]  ;;  %v1435_v36 = vld [vmem:[#allocation7 + $0x368] sm:$0xff] }
 0x1b1   :  { %1496 = vmatmul.f32.vlgmr.msra.gmra.mxu1 %v1323_v60  ;;  %1540 = vmatpush.msrb.mxu0 %v1357_v61  ;;  %v1329_v61 = vld [vmem:[#allocation7 + $0x18] sm:$0xff] }
 0x1b2   :  { %1560 = vmatpush.msrb.mxu1 %v1389_v53  ;;  %1514 = vmatpush.msra.mxu2 %v1392_v62  ;;  %v1361_v53 = vld [vmem:[#allocation7 + $0x118] sm:$0xff] }
 0x1b3   :  { %1541 = vmatpush.msrb.mxu0 %v1355_v63  ;;  %1523 = vmatpush.msra.mxu3 %v1446_v40  ;;  %v1397_v63 = vld [vmem:[#allocation7 + $0x238] sm:$0xff] }
 0x1b4   :  { %1561 = vmatpush.msrb.mxu1 %v1387_v0  ;;  %1515 = vmatpush.msra.mxu2 %v1390_v4  ;;  %v1436_v0 = vld [vmem:[#allocation7 + $0x370] sm:$0xff]  ;;  %v1327_v4 = vld [vmem:[#allocation7 + $0x8] sm:$0xff]  ;;  %v1425_v40 = vld [vmem:[#allocation7 + $0x318] sm:$0xff] }
 0x1b5   :  { %1542 = vmatpush.msrb.mxu0 %v1353_v5  ;;  %1524 = vmatpush.msra.mxu3 %v1444_v28  ;;  %v1359_v5 = vld [vmem:[#allocation7 + $0x108] sm:$0xff] }
 0x1b6   :  { %1562 = vmatpush.msrb.mxu1 %v1385_v6  ;;  %1580 = vmatpush.msrb.mxu2 %v1421_v7 }
 0x1b7   :  { %1543 = vmatpush.msrb.mxu0 %v1351_v8  ;;  %1525 = vmatpush.msra.mxu3 %v1442_v26  ;;  %v1395_v8 = vld [vmem:[#allocation7 + $0x228] sm:$0xff] }
 0x1b8   :  { %1563 = vmatpush.msrb.mxu1 %v1383_v10  ;;  %1581 = vmatpush.msrb.mxu2 %v1419_v11  ;;  %v1434_v10 = vld [vmem:[#allocation7 + $0x360] sm:$0xff] }
 0x1b9   :  { %1544 = vmatpush.msrb.mxu0 %v1349_v12  ;;  %1526 = vmatpush.msra.mxu3 %v1440_v52 }
 0x1ba   :  { %1564 = vmatpush.msrb.mxu1 %v1381_v13  ;;  %1582 = vmatpush.msrb.mxu2 %v1417_v14  ;;  %v1393_v13 = vld [vmem:[#allocation7 + $0x218] sm:$0xff]  ;;  %v1432_v14 = vld [vmem:[#allocation7 + $0x350] sm:$0xff] }
 0x1bb   :  { %1545 = vmatpush.msrb.mxu0 %v1347_v15  ;;  %1527 = vmatpush.msra.mxu3 %v1438_v58  ;;  %v1652_v58 = vld [vmem:[#allocation10 + $0xf0] sm:$0xff] }
 0x1bc   :  { %1565 = vmatpush.msrb.mxu1 %v1379_v16  ;;  %1583 = vmatpush.msrb.mxu2 %v1415_v18  ;;  %v1430_v18 = vld [vmem:[#allocation7 + $0x340] sm:$0xff] }
 0x1bd   :  { %1546 = vmatpush.msrb.mxu0 %v1345_v20  ;;  %1528 = vmatpush.msra.mxu3 %v1436_v0  ;;  %v1649_v0 = vld [vmem:[#allocation10 + $0xd8] sm:$0xff] }
 0x1be   :  { %1566 = vmatpush.msrb.mxu1 %v1377_v22  ;;  %1584 = vmatpush.msrb.mxu2 %v1413_v23  ;;  %v1428_v22 = vld [vmem:[#allocation7 + $0x330] sm:$0xff] }
 0x1bf   :  { %1547 = vmatpush.msrb.mxu0 %v1343_v19  ;;  %1529 = vmatpush.msra.mxu3 %v1434_v10  ;;  %v1451_v19 = vld [vmem:[#allocation7 + $0x3e8] sm:$0xff] }
 0x1c0   :  { %1567 = vmatpush.msrb.mxu1 %v1375_v24  ;;  %1585 = vmatpush.msrb.mxu2 %v1411_v29  ;;  %v1449_v24 = vld [vmem:[#allocation7 + $0x3d8] sm:$0xff]  ;;  %v1447_v29 = vld [vmem:[#allocation7 + $0x3c8] sm:$0xff] }
 0x1c1   :  { %1548 = vmatpush.msrb.mxu0 %v1341_v30  ;;  %v1099_v62 = vpop.f32.mrf.mxu0  ;;  %1530 = vmatpush.msra.mxu3 %v1432_v14  ;;  %v1445_v30 = vld [vmem:[#allocation7 + $0x3b8] sm:$0xff]  ;;  %v1646_v10 = vld [vmem:[#allocation10 + $0xc0] sm:$0xff]  ;;  %v1627_v14 = vld [vmem:[#allocation10 + $0x28] sm:$0xff] }
 0x1c2   :  { %1568 = vmatpush.msrb.mxu1 %v1373_v3  ;;  %1586 = vmatpush.msrb.mxu2 %v1409_v1  ;;  %v1100_v6 = vadd.f32 %v1099_v62, %v1080_v56  ;;  %v1443_v3 = vld [vmem:[#allocation7 + $0x3a8] sm:$0xff]  ;;  %v1653_v56 = vld [vmem:[#allocation10 + $0xf8] sm:$0xff] }
 0x1c3   :  { %1549 = vmatpush.msrb.mxu0 %v1339_v31  ;;  %1531 = vmatpush.msra.mxu3 %v1430_v18  ;;  %v1439_v1 = vld [vmem:[#allocation7 + $0x388] sm:$0xff]  ;;  %v1433_v31 = vld [vmem:[#allocation7 + $0x358] sm:$0xff] }
 0x1c4   :  { %1569 = vmatpush.msrb.mxu1 %v1371_v37  ;;  %1587 = vmatpush.msrb.mxu2 %v1407_v39  ;;  %v1431_v37 = vld [vmem:[#allocation7 + $0x348] sm:$0xff]  ;;  %v1644_v18 = vld [vmem:[#allocation10 + $0xb0] sm:$0xff] }
 0x1c5   :  { %1550 = vmatpush.msrb.mxu0 %v1337_v41  ;;  %1532 = vmatpush.msra.mxu3 %v1428_v22  ;;  %v1427_v39 = vld [vmem:[#allocation7 + $0x328] sm:$0xff] }
 0x1c6   :  { %1570 = vmatpush.msrb.mxu1 %v1369_v42  ;;  %1588 = vmatpush.msrb.mxu2 %v1405_v44  ;;  %v1423_v41 = vld [vmem:[#allocation7 + $0x308] sm:$0xff]  ;;  %v656_v42 = vperm.slane %v2199_v2, 3  ;;  %v1637_v2 = vld [vmem:[#allocation10 + $0x78] sm:$0xff] }
 0x1c7   :  { %1551 = vmatpush.msrb.mxu0 %v1335_v45  ;;  %1533 = vmatpush.msra.mxu3 %v1426_v32  ;;  %v1650_v62 = vld [vmem:[#allocation10 + $0xe0] sm:$0xff]  ;;  %v1643_v22 = vld [vmem:[#allocation10 + $0xa8] sm:$0xff] }
 0x1c8   :  { %1571 = vmatpush.msrb.mxu1 %v1367_v25  ;;  %1589 = vmatpush.msrb.mxu2 %v1403_v49  ;;  %v1119_v7 = vpop.f32.mrf.mxu1  ;;  %v1642_v32 = vld [vmem:[#allocation10 + $0xa0] sm:$0xff] }
 0x1c9   :  { %1552 = vmatpush.msrb.mxu0 %v1333_v27  ;;  %v1120_v11 = vadd.f32 %v1119_v7, %v1100_v6  ;;  %v1139_v12 = vpop.f32.mrf.mxu2  ;;  %1534 = vmatpush.msra.mxu3 %v1424_v54  ;;  %v1631_v6 = vld [vmem:[#allocation10 + $0x48] sm:$0xff]  ;;  %v1641_v54 = vld [vmem:[#allocation10 + $0x98] sm:$0xff] }
 0x1ca   :  { %1572 = vmatpush.msrb.mxu1 %v1365_v9  ;;  %1590 = vmatpush.msrb.mxu2 %v1401_v51  ;;  %v1647_v7 = vld [vmem:[#allocation10 + $0xc8] sm:$0xff] }
 0x1cb   :  { %1553 = vmatpush.msrb.mxu0 %v1331_v33  ;;  %v1140_v15 = vadd.f32 %v1139_v12, %v1120_v11  ;;  %v1629_v11 = vld [vmem:[#allocation10 + $0x38] sm:$0xff] }
 0x1cc   :  { %1573 = vmatpush.msrb.mxu1 %v1363_v46  ;;  %1591 = vmatpush.msrb.mxu2 %v1399_v57  ;;  %v1159_v16 = vpop.f32.mrf.mxu3  ;;  %v1635_v57 = vld [vmem:[#allocation10 + $0x68] sm:$0xff]  ;;  %v1645_v12 = vld [vmem:[#allocation10 + $0xb8] sm:$0xff] }
 0x1cd   :  { %1554 = vmatpush.msrb.mxu0 %v1329_v61  ;;  %v1160_v20 = vadd.f32 %v1159_v16, %v1140_v15  ;;  %v1651_v61 = vld [vmem:[#allocation10 + $0xe8] sm:$0xff]  ;;  %v1626_v15 = vld [vmem:[#allocation10 + $0x20] sm:$0xff]  ;;  %v1625_v16 = vld [vmem:[#allocation10 + $0x18] sm:$0xff] }
 0x1ce   :  { %1574 = vmatpush.msrb.mxu1 %v1361_v53  ;;  %1592 = vmatpush.msrb.mxu2 %v1397_v63  ;;  %v1634_v53 = vld [vmem:[#allocation10 + $0x60] sm:$0xff]  ;;  %v1633_v63 = vld [vmem:[#allocation10 + $0x58] sm:$0xff] }
 0x1cf   :  { %1555 = vmatpush.msrb.mxu0 %v1327_v4  ;;  %v1324_v23 = vmax.f32 %v1160_v20, 0.0  ;;  %v1632_v4 = vld [vmem:[#allocation10 + $0x50] sm:$0xff]  ;;  %v1623_v20 = vld [vmem:[#allocation10 + $0x8] sm:$0xff] }
 0x1d0   :  { %1575 = vmatpush.msrb.mxu1 %v1359_v5  ;;  %1556 = vmatmul.f32.vlgmr.msrb.gmra.mxu0 %v1322_v59  ;;  %v1422_v59 = vld [vmem:[#allocation7 + $0x300] sm:$0xff]  ;;  %v1648_v5 = vld [vmem:[#allocation10 + $0xd0] sm:$0xff] }
 0x1d1   :  { %1576 = vmatmul.f32.vlgmr.msrb.gmra.mxu1 %v1323_v60  ;;  %1593 = vmatpush.msrb.mxu2 %v1395_v8  ;;  %v1453_v60 = vld [vmem:[#allocation7 + $0x3f8] sm:$0xff]  ;;  %v1630_v8 = vld [vmem:[#allocation10 + $0x40] sm:$0xff] }
 0x1d2   :  { %1516 = vmatmul.f32.vlgmr.msra.gmra.mxu2 %v1324_v23  ;;  %1535 = vmatpush.msra.mxu3 %v1422_v59  ;;  %v1640_v59 = vld [vmem:[#allocation10 + $0x90] sm:$0xff] }
 0x1d3   :  { %1594 = vmatpush.msrb.mxu2 %v1393_v13  ;;  %1658 = vmatpush.msra.mxu0 %v1637_v2  ;;  %v1628_v13 = vld [vmem:[#allocation10 + $0x30] sm:$0xff] }
 0x1d4   :  { %1600 = vmatpush.msrb.mxu3 %v1453_v60  ;;  %1678 = vmatpush.msra.mxu1 %v1653_v56  ;;  %v1639_v60 = vld [vmem:[#allocation10 + $0x88] sm:$0xff]  ;;  %v1703_v2 = vld [vmem:[%s2300_s7 + $0x20] sm:$0xff] }
 0x1d5   :  { %1595 = vmatpush.msrb.mxu2 %v1391_v17  ;;  %1659 = vmatpush.msra.mxu0 %v1636_v55  ;;  %v1624_v17 = vld [vmem:[#allocation10 + $0x10] sm:$0xff]  ;;  %v1701_v56 = vld [vmem:[%s2300_s7 + $0x10] sm:$0xff] }
 0x1d6   :  { %1601 = vmatpush.msrb.mxu3 %v1451_v19  ;;  %1679 = vmatpush.msra.mxu1 %v1652_v58  ;;  %v1638_v19 = vld [vmem:[#allocation10 + $0x80] sm:$0xff]  ;;  %v1702_v55 = vld [vmem:[%s2300_s7 + $0x18] sm:$0xff]  ;;  %v1699_v58 = vld [vmem:[%s2300_s7] sm:$0xff] }
 0x1d7   :  { %1660 = vmatpush.msra.mxu0 %v1635_v57  ;;  %v1700_v57 = vld [vmem:[%s2300_s7 + $0x8] sm:$0xff] }
 0x1d8   :  { %1602 = vmatpush.msrb.mxu3 %v1449_v24  ;;  %1680 = vmatpush.msra.mxu1 %v1651_v61  ;;  %v1714_v24 = vld [vmem:[%s2300_s7 + $0x78] sm:$0xff]  ;;  %v1806_v61 = vld [vmem:[#allocation11] ss:$0 sm:$0xff] }
 0x1d9   :  { %1661 = vmatpush.msra.mxu0 %v1634_v53  ;;  %1719 = vmatpush.msra.mxu2 %v1714_v24 }
 0x1da   :  { %1596 = vmatmul.f32.vlgmr.msrb.gmra.mxu2 %v1324_v23  ;;  %1603 = vmatpush.msrb.mxu3 %v1447_v29  ;;  %v1622_v23 = vld [vmem:[#allocation10] sm:$0xff] }
 0x1db   :  { %1681 = vmatpush.msra.mxu1 %v1650_v62  ;;  %1662 = vmatpush.msra.mxu0 %v1633_v63  ;;  %v1713_v29 = vld [vmem:[%s2300_s7 + $0x70] sm:$0xff] }
 0x1dc   :  { %1604 = vmatpush.msrb.mxu3 %v1445_v30  ;;  %v1712_v30 = vld [vmem:[%s2300_s7 + $0x68] sm:$0xff]  ;;  %1720 = vmatpush.msra.mxu2 %v1713_v29 }
 0x1dd   :  { %1682 = vmatpush.msra.mxu1 %v1649_v0  ;;  %1663 = vmatpush.msra.mxu0 %v1632_v4 }
 0x1de   :  { %1605 = vmatpush.msrb.mxu3 %v1443_v3  ;;  %v1711_v3 = vld [vmem:[%s2300_s7 + $0x60] sm:$0xff]  ;;  %1721 = vmatpush.msra.mxu2 %v1712_v30 }
 0x1df   :  { %1683 = vmatpush.msra.mxu1 %v1648_v5  ;;  %1664 = vmatpush.msra.mxu0 %v1631_v6  ;;  %v1807_v5 = vld [vmem:[#allocation13] ss:$0 sm:$0xff] }
 0x1e0   :  { %1606 = vmatpush.msrb.mxu3 %v1441_v34  ;;  %v1454_v34 = vld [vmem:[#allocation8] sm:$0x3]  ;;  %1722 = vmatpush.msra.mxu2 %v1711_v3 }
 0x1e1   :  { %1684 = vmatpush.msra.mxu1 %v1647_v7  ;;  %1665 = vmatpush.msra.mxu0 %v1630_v8 }
 0x1e2   :  { %1607 = vmatpush.msrb.mxu3 %v1439_v1  ;;  %v1710_v1 = vld [vmem:[%s2300_s7 + $0x58] sm:$0xff] }
 0x1e3   :  { %1685 = vmatpush.msra.mxu1 %v1646_v10  ;;  %1666 = vmatpush.msra.mxu0 %v1629_v11 }
 0x1e4   :  { %1608 = vmatpush.msrb.mxu3 %v1437_v35  ;;  %v1456_v35 = vperm.slane %v1454_v34, 0  ;;  %1723 = vmatpush.msra.mxu2 %v1710_v1 }
 0x1e5   :  { %1686 = vmatpush.msra.mxu1 %v1645_v12  ;;  %1667 = vmatpush.msra.mxu0 %v1628_v13 }
 0x1e6   :  { %1609 = vmatpush.msrb.mxu3 %v1435_v36  ;;  %v1709_v36 = vld [vmem:[%s2300_s7 + $0x50] sm:$0xff] }
 0x1e7   :  { %1668 = vmatpush.msra.mxu0 %v1627_v14  ;;  %1687 = vmatpush.msra.mxu1 %v1644_v18 }
 0x1e8   :  { %1610 = vmatpush.msrb.mxu3 %v1433_v31  ;;  %1724 = vmatpush.msra.mxu2 %v1709_v36 }
 0x1e9   :  { %1669 = vmatpush.msra.mxu0 %v1626_v15  ;;  %1688 = vmatpush.msra.mxu1 %v1643_v22 }
 0x1ea   :  { %1611 = vmatpush.msrb.mxu3 %v1431_v37  ;;  %v1708_v37 = vld [vmem:[%s2300_s7 + $0x48] sm:$0xff] }
 0x1eb   :  { %1670 = vmatpush.msra.mxu0 %v1625_v16  ;;  %1689 = vmatpush.msra.mxu1 %v1642_v32 }
 0x1ec   :  { %1612 = vmatpush.msrb.mxu3 %v1429_v38  ;;  %1725 = vmatpush.msra.mxu2 %v1708_v37 }
 0x1ed   :  { %1671 = vmatpush.msra.mxu0 %v1624_v17  ;;  %1690 = vmatpush.msra.mxu1 %v1641_v54 }
 0x1ee   :  { %1613 = vmatpush.msrb.mxu3 %v1427_v39  ;;  %v1707_v39 = vld [vmem:[%s2300_s7 + $0x40] sm:$0xff] }
 0x1ef   :  { %1672 = vmatpush.msra.mxu0 %v1623_v20  ;;  %1691 = vmatpush.msra.mxu1 %v1640_v59 }
 0x1f0   :  { %1614 = vmatpush.msrb.mxu3 %v1425_v40  ;;  %1726 = vmatpush.msra.mxu2 %v1707_v39 }
 0x1f1   :  { %1673 = vmatpush.msra.mxu0 %v1622_v23  ;;  %1692 = vmatpush.msra.mxu1 %v1639_v60 }
 0x1f2   :  { %1615 = vmatpush.msrb.mxu3 %v1423_v41  ;;  %v1706_v41 = vld [vmem:[%s2300_s7 + $0x38] sm:$0xff] }
 0x1f3   :  { %1693 = vmatpush.msra.mxu1 %v1638_v19  ;;  %1727 = vmatpush.msra.mxu2 %v1706_v41 }
 0x1fe   :  { %v1179_v43 = vpop.f32.mrf.mxu0 }
 0x1ff   :  { %v1180_v44 = vadd.f32 %v1179_v43, %v656_v42  ;;  %v1199_v28 = vpop.f32.mrf.mxu1 }
 0x201   :  { %v1200_v45 = vadd.f32 %v1199_v28, %v1180_v44  ;;  %v1457_v44 = vperm.slane %v1454_v34, 1 }
 0x202   :  { %v1219_v25 = vpop.f32.mrf.mxu2 }
 0x203   :  { %v1220_v21 = vadd.f32 %v1219_v25, %v1200_v45  ;;  %v1239_v47 = vpop.f32.mrf.mxu3 }
 0x205   :  { %v1240_v48 = vadd.f32 %v1239_v47, %v1220_v21 }
 0x20b   :  { %v1279_v27 = vpop.f32.mrf.mxu1 }
 0x211   :  { %v1259_v49 = vpop.f32.mrf.mxu0 }
 0x212   :  { %v1260_v26 = vadd.f32 %v1259_v49, %v1240_v48  ;;  %v1299_v50 = vpop.f32.mrf.mxu2 }
 0x214   :  { %v1280_v9 = vadd.f32 %v1279_v27, %v1260_v26 }
 0x216   :  { %v1300_v51 = vadd.f32 %v1299_v50, %v1280_v9  ;;  %v1319_v52 = vpop.f32.mrf.mxu3 }
 0x218   :  { %v1320_v33 = vadd.f32 %v1319_v52, %v1300_v51 }
 0x21a   :  { %v1325_v46 = vmax.f32 %v1320_v33, 0.0  ;;  %v1705_v33 = vld [vmem:[%s2300_s7 + $0x30] sm:$0xff] }
 0x21b   :  { %1728 = vmatpush.msra.mxu2 %v1705_v33 }
 0x21c   :  { %1536 = vmatmul.f32.vlgmr.msra.gmra.mxu3 %v1325_v46 }
 0x224   :  { %1616 = vmatmul.f32.vlgmr.msrb.gmra.mxu3 %v1325_v46  ;;  %v1704_v46 = vld [vmem:[%s2300_s7 + $0x28] sm:$0xff] }
 0x225   :  { %1729 = vmatpush.msra.mxu2 %v1704_v46 }
 0x227   :  { %1730 = vmatpush.msra.mxu2 %v1703_v2 }
 0x229   :  { %1731 = vmatpush.msra.mxu2 %v1702_v55 }
 0x22b   :  { %1732 = vmatpush.msra.mxu2 %v1701_v56 }
 0x22d   :  { %v1477_v31 = vpop.f32.mrf.mxu0  ;;  %1733 = vmatpush.msra.mxu2 %v1700_v57 }
 0x22e   :  { %v1478_v38 = vadd.f32 %v1477_v31, %v1456_v35  ;;  %v1497_v42 = vpop.f32.mrf.mxu1 }
 0x22f   :  { %1734 = vmatpush.msra.mxu2 %v1699_v58 }
 0x230   :  { %v1498_v43 = vadd.f32 %v1497_v42, %v1478_v38 }
 0x24d   :  { %v1557_v28 = vpop.f32.mrf.mxu0 }
 0x24e   :  { %v1558_v21 = vadd.f32 %v1557_v28, %v1457_v44  ;;  %v1577_v49 = vpop.f32.mrf.mxu1 }
 0x250   :  { %v1578_v27 = vadd.f32 %v1577_v49, %v1558_v21 }
 0x255   :  { %v1517_v40 = vpop.f32.mrf.mxu2 }
 0x256   :  { %v1518_v45 = vadd.f32 %v1517_v40, %v1498_v43 }
 0x25d   :  { %v1597_v26 = vpop.f32.mrf.mxu2 }
 0x25e   :  { %v1598_v9 = vadd.f32 %v1597_v26, %v1578_v27 }
 0x29f   :  { %v1537_v25 = vpop.f32.mrf.mxu3 }
 0x2a0   :  { %v1538_v47 = vadd.f32 %v1537_v25, %v1518_v45 }
 0x2a2   :  { %v1620_v48 = vmax.f32 %v1538_v47, 0.0 }
 0x2a4   :  { %1674 = vmatmul.f32.vlgmr.msra.gmra.mxu0 %v1620_v48 }
 0x2a7   :  { %v1617_v50 = vpop.f32.mrf.mxu3 }
 0x2a8   :  { %v1618_v51 = vadd.f32 %v1617_v50, %v1598_v9 }
 0x2aa   :  { %v1621_v52 = vmax.f32 %v1618_v51, 0.0 }
 0x2ac   :  { %1694 = vmatmul.f32.vlgmr.msra.gmra.mxu1 %v1621_v52 }
 0x321   :  { %v1675_v53 = vpop.f32.mrf.mxu0 }
 0x322   :  { %v1676_v62 = vadd.f32 %v1806_v61, %v1675_v53 }
 0x329   :  { %v1695_v63 = vpop.f32.mrf.mxu1 }
 0x32a   :  { %v1696_v0 = vadd.f32 %v1695_v63, %v1676_v62 }
 0x32c   :  { %v1698_v4 = vmax.f32 %v1696_v0, 0.0 }
 0x32e   :  { %1735 = vmatmul.f32.vlgmr.msra.gmra.mxu2 %v1698_v4 }
 0x3b1   :  { %v1736_v6 = vpop.f32.mrf.mxu2 }
 0x3b2   :  { %v1737_v7 = vadd.f32 %v1807_v5, %v1736_v6 }
 0x3b4   :  { %v1741_v8 = vsel %vm1739_vm0, %v1737_v7, -inf  ;;  %1740 = vst.msk [vmem:[#allocation14] sm:$0x3] %vm1739_vm0, %v1737_v7 }
 0x3b5   :  { %1742 = vmax.xlane.f32.xlu0 %v1741_v8  ;;  %1765 = dma.vmem_to_hbm [thread:$0]  %s1761_s14, 32, %s1763_s13, [#allocation4]  }
 0x428   :  { %v1743_v10 = vpop.xlane.xlu0 %1742 }
 0x429   :  { %v1744_v11 = vsub.f32 %v1737_v7, %v1743_v10 }
 0x42b   :  { %v1745_v12 = vmul.f32 1.442695, %v1744_v11 }
 0x42d   :  { %1808 = vpow2.f32 %v1745_v12 }
 0x433   :  { %v1809_v13 = vpop.eup %1808 }
 0x434   :  { %v1747_v14 = vsel %vm1739_vm0, %v1809_v13, 0.0 }
 0x435   :  { %1748 = vadd.xlane.f32.xlu0 %v1747_v14 }
 0x4a8   :  { %v1749_v15 = vpop.xlane.xlu0 %1748 }
 0x4a9   :  { %1810 = vlog2.f32 %v1749_v15 }
 0x4af   :  { %v1811_v16 = vpop.eup %1810 }
 0x4b0   :  { %v1751_v17 = vmul.f32 0.6931472, %v1811_v16 }
 0x4b2   :  { %v1752_v18 = vadd.f32 %v1751_v17, %v1743_v10 }
 0x4b4   :  { %v1753_v20 = vsub.f32 %v1737_v7, %v1752_v18 }
 0x4b6   :  { %1754 = vst.msk [vmem:[#allocation15] sm:$0x3] %vm1739_vm0, %v1753_v20 }
 0x4b7   :  { %1776 = dma.vmem_to_hbm [thread:$0]  %s1772_s16, 32, %s1774_s18, [#allocation16]  }
 0x4b8   :  { %2044 = dma.done.wait [#allocation4], 32  }
 0x4b9   :  { %2045 = vsyncadd [#allocation4], 4294967264 }
 0x4ba   :  { %2046 = dma.done.wait [#allocation16], 32  }
 0x4bb   :  { %2047 = vsyncadd [#allocation16], 4294967264 }
 0x4bc   :  { %1785 = vsyncpa [#allocation3], 1 }
 0x4bd   :  { %1786 = vsyncpa [#allocation6], 1 }
 0x4be   :  { %1787 = vsyncpa [#allocation9], 1 }
 0x4bf   :  { %1788 = vsyncpa [#allocation12], 1 }
 0x4c0   :  { %1789 = vsyncpa [#allocation4], 1 }
 0x4c1   :  { %1790 = vsyncpa [#allocation16], 1 }

</bundles_post_ra>
